<compile_context>
chip_gen: v5e
topology: v5e:2x2
jax: 0.10.0
libtpu: 0.0.40
codegen_flags: <defaults>
</compile_context>

<pallas_src>
import functools

import jax
import jax.numpy as jnp
from jax.experimental import pallas as pl
from jax.experimental.pallas import tpu as pltpu


# --------------------------------------------------------------------------------------
# Shared math helpers (used both inside the kernel and in the pure-JAX reference)
# --------------------------------------------------------------------------------------
def _elu(x):
    # nn.ELU(alpha=1.0)
    return jnp.where(x > 0, x, jnp.exp(x) - 1.0)


def _bn_train(x, gamma, beta, eps=1e-5):
    # BatchNorm1d, training mode: batch mean, biased batch variance.
    mean = jnp.mean(x, axis=0, keepdims=True)
    var = jnp.mean(jnp.square(x - mean), axis=0, keepdims=True)
    return (x - mean) * jax.lax.rsqrt(var + eps) * gamma + beta


# --------------------------------------------------------------------------------------
# Fused kernel: whole VAE forward in one body
# --------------------------------------------------------------------------------------
def _vae_fused_kernel(x_ref, eps_ref, sty_ref,
                      w1e_ref, b1e_ref, g1e_ref, be1e_ref,
                      w2e_ref, b2e_ref, g2e_ref, be2e_ref,
                      w3e_ref, b3e_ref,
                      p_ref,
                      wd1_ref, bd1_ref, gd1_ref, bed1_ref,
                      wd2_ref, bd2_ref, gd2_ref, bed2_ref,
                      wd3_ref, bd3_ref,
                      dw_ref, db_ref,
                      out_ref):
    f32 = jnp.float32
    bf16 = jnp.bfloat16

    def lin(x, w_ref, b_ref):
        # bf16 x bf16 MXU pass with f32 accumulation; bias/activation math stays f32.
        return jnp.dot(x.astype(bf16), w_ref[...],
                       preferred_element_type=f32) + b_ref[...]

    # ---- 4 encoder branches packed along lanes: [con@content | con@style | sti@content | sti@style]
    h = _elu(_bn_train(lin(x_ref[...], w1e_ref, b1e_ref), g1e_ref[...], be1e_ref[...]))
    h = _elu(_bn_train(lin(h, w2e_ref, b2e_ref), g2e_ref[...], be2e_ref[...]))
    h = lin(h, w3e_ref, b3e_ref)                 # (B, 2*zdim), mu-first column layout
    zdim = h.shape[1] // 2
    cs = zdim // 2
    mu_all = h[:, :zdim]                         # [mu_cc | mu_cs | mu_sc | mu_ss]
    lv_all = h[:, zdim:]                         # [lv_cc | lv_cs | lv_sc | lv_ss]
    z_all = mu_all + eps_ref[...] * jnp.exp(0.5 * lv_all)

    # ---- gather the 4 decoder inputs with a 0/1 selection matmul (lane gather on MXU)
    dec_in = jnp.dot(z_all.astype(bf16), p_ref[...],
                     preferred_element_type=f32)                      # (B, 4*(ctx+sty))

    # ---- 4 decoder branches packed along lanes (block-diagonal shared decoder weights)
    d = _elu(_bn_train(lin(dec_in, wd1_ref, bd1_ref), gd1_ref[...], bed1_ref[...]))
    d = _elu(_bn_train(lin(d, wd2_ref, bd2_ref), gd2_ref[...], bed2_ref[...]))
    recons = jnp.maximum(lin(d, wd3_ref, bd3_ref), 0.0)               # (B, 4*input_dim)

    # ---- delta encoder + real_delta
    delta = lin(sty_ref[...], dw_ref, db_ref)                         # (B, ctx+sty)
    real_delta = z_all[:, cs:] - z_all[:, :cs]                        # (B, ctx+sty)

    # ---- three lane-dense stores (each 128-wide / 128-aligned at the example dims)
    out_ref[:, 0:2 * zdim] = jnp.concatenate([z_all, mu_all], axis=1)
    out_ref[:, 2 * zdim:3 * zdim + 2 * cs] = jnp.concatenate(
        [lv_all, delta, real_delta], axis=1)
    out_ref[:, 3 * zdim + 2 * cs:] = recons


# --------------------------------------------------------------------------------------
# Parameter construction (PyTorch-equivalent raw params) and lane-packing
# --------------------------------------------------------------------------------------
def _make_mlp_params(key, in_dim, hidden_dim, out_dim):
    ks = jax.random.split(key, 10)
    s = 0.05
    w1 = s * jax.random.normal(ks[0], (in_dim, hidden_dim), jnp.float32)
    b1 = s * jax.random.normal(ks[1], (1, hidden_dim), jnp.float32)
    g1 = 1.0 + 0.01 * jax.random.normal(ks[2], (1, hidden_dim), jnp.float32)
    be1 = 0.01 * jax.random.normal(ks[3], (1, hidden_dim), jnp.float32)
    w2 = s * jax.random.normal(ks[4], (hidden_dim, hidden_dim), jnp.float32)
    b2 = s * jax.random.normal(ks[5], (1, hidden_dim), jnp.float32)
    g2 = 1.0 + 0.01 * jax.random.normal(ks[6], (1, hidden_dim), jnp.float32)
    be2 = 0.01 * jax.random.normal(ks[7], (1, hidden_dim), jnp.float32)
    w3 = s * jax.random.normal(ks[8], (hidden_dim, out_dim), jnp.float32)
    b3 = s * jax.random.normal(ks[9], (1, out_dim), jnp.float32)
    return (w1, b1, g1, be1, w2, b2, g2, be2, w3, b3)


def pack_params(content_p, style_p, delta_p, decoder_p, dims):
    """Pack the 4 encoder branches / 4 decoder copies along the lane axis.

    Runs ONCE at setup time (block_diag / one_hot / tiling / bf16 casts are more
    expensive than the fused kernel itself -- never call this per step).
    Matmul weights are returned in bfloat16; bias / BN params stay float32.
    """
    input_dim, hid, ctx, sl = dims
    f32 = jnp.float32
    bf16 = jnp.bfloat16

    encs = (content_p, style_p, content_p, style_p)   # branch g -> encoder params
    in_slot = (0, 0, 1, 1)                            # branch g -> con(0) / sti(1)
    lats = (ctx, sl, ctx, sl)                         # branch g -> latent dim

    # Layer-1 contraction dim padded to a multiple of 128 (full-width MXU K tile).
    in_pad = 128 * max(1, -(-(2 * input_dim) // 128))

    # ---- encoder layer 1: 2x4 block matrix, zero-padded rows (in_pad, 4*hid)
    w1e = jnp.zeros((in_pad, 4 * hid), f32)
    b1e, g1e, be1e = [], [], []
    w2_blocks, b2e, g2e, be2e = [], [], [], []
    for g, (p, slot) in enumerate(zip(encs, in_slot)):
        w1, b1, ga1, bt1, w2, b2, ga2, bt2, _, _ = p
        w1e = w1e.at[slot * input_dim:(slot + 1) * input_dim,
                     g * hid:(g + 1) * hid].set(w1)
        b1e.append(b1); g1e.append(ga1); be1e.append(bt1)
        w2_blocks.append(w2)
        b2e.append(b2); g2e.append(ga2); be2e.append(bt2)
    b1e = jnp.concatenate(b1e, axis=1)
    g1e = jnp.concatenate(g1e, axis=1)
    be1e = jnp.concatenate(be1e, axis=1)

    # ---- encoder layer 2: block-diagonal (4*hid, 4*hid)
    w2e = jax.scipy.linalg.block_diag(*w2_blocks)
    b2e = jnp.concatenate(b2e, axis=1)
    g2e = jnp.concatenate(g2e, axis=1)
    be2e = jnp.concatenate(be2e, axis=1)

    # ---- encoder layer 3: block-diagonal, then permute columns to a mu-first layout
    w3_blk = jax.scipy.linalg.block_diag(*[p[8] for p in encs])       # (4*hid, 2*sum(lats))
    b3_cat = jnp.concatenate([p[9] for p in encs], axis=1)
    mu_cols, lv_cols, off = [], [], 0
    for lat in lats:
        mu_cols.append(jnp.arange(off, off + lat))
        lv_cols.append(jnp.arange(off + lat, off + 2 * lat))
        off += 2 * lat
    perm = jnp.concatenate(mu_cols + lv_cols)
    w3e = w3_blk[:, perm]
    b3e = b3_cat[:, perm]

    # ---- decoder-input selection matrix (z lanes -> 4 concatenated decoder inputs)
    zoff, o = [], 0
    for lat in lats:
        zoff.append((o, o + lat)); o += lat
    z_cc, z_cs, z_sc, z_ss = zoff
    src = jnp.concatenate([
        jnp.arange(*z_cc), jnp.arange(*z_cs),   # real_con : [z_con_con, z_con_sty]
        jnp.arange(*z_sc), jnp.arange(*z_cs),   # fake_con : [z_sti_con, z_con_sty]
        jnp.arange(*z_sc), jnp.arange(*z_ss),   # real_sti : [z_sti_con, z_sti_sty]
        jnp.arange(*z_cc), jnp.arange(*z_ss),   # fake_sti : [z_con_con, z_sti_sty]
    ])
    p_sel = jax.nn.one_hot(src, o, dtype=f32).T                       # (zdim, 4*(ctx+sl))

    # ---- decoder: 4 identical copies along lanes (block-diagonal shared weights)
    wd1, bd1, gd1, bed1, wd2, bd2, gd2, bed2, wd3, bd3 = decoder_p
    wd1e = jax.scipy.linalg.block_diag(*([wd1] * 4))
    wd2e = jax.scipy.linalg.block_diag(*([wd2] * 4))
    wd3e = jax.scipy.linalg.block_diag(*([wd3] * 4))
    bd1e = jnp.tile(bd1, (1, 4)); gd1e = jnp.tile(gd1, (1, 4)); bed1e = jnp.tile(bed1, (1, 4))
    bd2e = jnp.tile(bd2, (1, 4)); gd2e = jnp.tile(gd2, (1, 4)); bed2e = jnp.tile(bed2, (1, 4))
    bd3e = jnp.tile(bd3, (1, 4))

    dw, db = delta_p

    # Cast matmul operands (weights / selection matrix) to bf16 once, here.
    return (w1e.astype(bf16), b1e, g1e, be1e,
            w2e.astype(bf16), b2e, g2e, be2e,
            w3e.astype(bf16), b3e,
            p_sel.astype(bf16),
            wd1e.astype(bf16), bd1e, gd1e, bed1e,
            wd2e.astype(bf16), bd2e, gd2e, bed2e,
            wd3e.astype(bf16), bd3e,
            dw.astype(bf16), db)


# --------------------------------------------------------------------------------------
# Fused forward (mirrors VAE.forward) — ONE pallas_call
# --------------------------------------------------------------------------------------
@functools.partial(jax.jit, static_argnames=("dims",))
def vae_forward(con, sti, sty, eps_all, packed, *, dims):
    input_dim, hid, ctx, sl = dims
    B = con.shape[0]
    cs = ctx + sl
    zdim = 2 * cs
    out_width = 3 * zdim + 2 * cs + 4 * input_dim     # z | mu | logvar | delta | real_delta | recons

    # Layer-1 input padded to the packed weight's (128-multiple) contraction dim.
    in_pad = packed[0].shape[0]
    pad = in_pad - 2 * input_dim
    x_packed = jnp.concatenate(
        [con, sti, jnp.zeros((B, pad), jnp.float32)], axis=1)         # (B, in_pad)

    inputs = (x_packed, eps_all, sty) + tuple(packed)

    # Advisory cost estimate: tells XLA this custom call is cheap.
    weight_idx = (0, 4, 8, 10, 11, 15, 19, 21)        # matmul weights inside `packed`
    flops = int(2 * B * sum(packed[i].shape[0] * packed[i].shape[1] for i in weight_idx))
    transcendentals = int(B * (2 * 4 * hid + 2 * 4 * hid + zdim))
    bytes_accessed = int(sum(a.size * a.dtype.itemsize for a in inputs) + 4 * B * out_width)

    slab = pl.pallas_call(
        _vae_fused_kernel,
        out_shape=jax.ShapeDtypeStruct((B, out_width), jnp.float32),
        in_specs=[pl.BlockSpec(memory_space=pltpu.MemorySpace.VMEM)] * len(inputs),
        out_specs=pl.BlockSpec(memory_space=pltpu.MemorySpace.VMEM),
        compiler_params=pltpu.CompilerParams(vmem_limit_bytes=4 * 1024 * 1024),
        cost_estimate=pl.CostEstimate(flops=flops,
                                      transcendentals=transcendentals,
                                      bytes_accessed=bytes_accessed),
    )(*inputs)

    # ---- slice the lane-dense slab back into the output dict
    # (Kept for module-semantics parity; latency-critical consumers should take `slab`
    #  or the three 128-wide groups directly and fuse their loss math onto slices.)
    def split4(a):
        outs, o = [], 0
        for lat in (ctx, sl, ctx, sl):
            outs.append(a[:, o:o + lat]); o += lat
        return outs

    z_all = slab[:, 0:zdim]
    mu_all = slab[:, zdim:2 * zdim]
    lv_all = slab[:, 2 * zdim:3 * zdim]
    delta = slab[:, 3 * zdim:3 * zdim + cs]
    real_delta = slab[:, 3 * zdim + cs:3 * zdim + 2 * cs]
    recons = slab[:, 3 * zdim + 2 * cs:]

    z_cc, z_cs, z_sc, z_ss = split4(z_all)
    mu_cc, mu_cs, mu_sc, mu_ss = split4(mu_all)
    lv_cc, lv_cs, lv_sc, lv_ss = split4(lv_all)

    return {
        "z_con_con": z_cc, "mu_con_con": mu_cc, "var_con_con": lv_cc,
        "z_con_sty": z_cs, "mu_con_sty": mu_cs, "var_con_sty": lv_cs,
        "z_sti_con": z_sc, "mu_sti_con": mu_sc, "var_sti_con": lv_sc,
        "z_sti_sty": z_ss, "mu_sti_sty": mu_ss, "var_sti_sty": lv_ss,
        "real_con_recon": recons[:, 0:input_dim],
        "fake_con_recon": recons[:, input_dim:2 * input_dim],
        "real_sti_recon": recons[:, 2 * input_dim:3 * input_dim],
        "fake_sti_recon": recons[:, 3 * input_dim:4 * input_dim],
        "delta": delta, "real_delta": real_delta,
    }


# --------------------------------------------------------------------------------------
# Pure-JAX reference (same math, unpacked, full f32) used only for validation.
# The kernel runs bf16 MXU passes (same as default-precision f32 dots), hence the
# loose 2e-2 tolerance against this HIGHEST-precision reference.
# --------------------------------------------------------------------------------------
def _ref_encoder(x, p, eps):
    w1, b1, g1, be1, w2, b2, g2, be2, w3, b3 = p
    hi = jax.lax.Precision.HIGHEST
    h = _elu(_bn_train(jnp.dot(x, w1, precision=hi) + b1, g1, be1))
    h = _elu(_bn_train(jnp.dot(h, w2, precision=hi) + b2, g2, be2))
    h = jnp.dot(h, w3, precision=hi) + b3
    lat = h.shape[1] // 2
    mu, lv = h[:, :lat], h[:, lat:]
    return mu + eps * jnp.exp(0.5 * lv), mu, lv


def _ref_decoder(x, p):
    w1, b1, g1, be1, w2, b2, g2, be2, w3, b3 = p
    hi = jax.lax.Precision.HIGHEST
    h = _elu(_bn_train(jnp.dot(x, w1, precision=hi) + b1, g1, be1))
    h = _elu(_bn_train(jnp.dot(h, w2, precision=hi) + b2, g2, be2))
    return jnp.maximum(jnp.dot(h, w3, precision=hi) + b3, 0.0)


def _ref_forward(con, sti, sty, params, dims, eps_all):
    input_dim, hid, ctx, sl = dims
    content_p, style_p, (dw, db), decoder_p = params
    e_cc = eps_all[:, :ctx]
    e_cs = eps_all[:, ctx:ctx + sl]
    e_sc = eps_all[:, ctx + sl:2 * ctx + sl]
    e_ss = eps_all[:, 2 * ctx + sl:]
    z_cc, mu_cc, lv_cc = _ref_encoder(con, content_p, e_cc)
    z_cs, mu_cs, lv_cs = _ref_encoder(con, style_p, e_cs)
    z_sc, mu_sc, lv_sc = _ref_encoder(sti, content_p, e_sc)
    z_ss, mu_ss, lv_ss = _ref_encoder(sti, style_p, e_ss)
    delta = jnp.dot(sty, dw, precision=jax.lax.Precision.HIGHEST) + db
    cat_cc_cs = jnp.concatenate([z_cc, z_cs], 1)
    cat_sc_cs = jnp.concatenate([z_sc, z_cs], 1)
    cat_sc_ss = jnp.concatenate([z_sc, z_ss], 1)
    cat_cc_ss = jnp.concatenate([z_cc, z_ss], 1)
    return {
        "z_con_con": z_cc, "mu_con_con": mu_cc, "var_con_con": lv_cc,
        "z_con_sty": z_cs, "mu_con_sty": mu_cs, "var_con_sty": lv_cs,
        "z_sti_con": z_sc, "mu_sti_con": mu_sc, "var_sti_con": lv_sc,
        "z_sti_sty": z_ss, "mu_sti_sty": mu_ss, "var_sti_sty": lv_ss,
        "real_con_recon": _ref_decoder(cat_cc_cs, decoder_p),
        "fake_con_recon": _ref_decoder(cat_sc_cs, decoder_p),
        "real_sti_recon": _ref_decoder(cat_sc_ss, decoder_p),
        "fake_sti_recon": _ref_decoder(cat_cc_ss, decoder_p),
        "delta": delta, "real_delta": cat_sc_ss - cat_cc_cs,
    }


# --------------------------------------------------------------------------------------
# Main
# --------------------------------------------------------------------------------------
if __name__ == "__main__":
    batch = 8
    input_dim = 32
    hidden_dim = 64
    context_latent_dim = 16
    style_latent_dim = 16
    dims = (input_dim, hidden_dim, context_latent_dim, style_latent_dim)

    root = jax.random.PRNGKey(0)
    k_con, k_sti, k_sty, k_pc, k_ps, k_pd, k_pdec, k_noise = jax.random.split(root, 8)

    con = jax.random.normal(k_con, (batch, input_dim), jnp.float32)
    sti = jax.random.normal(k_sti, (batch, input_dim), jnp.float32)
    sty = jax.random.normal(k_sty, (batch, input_dim), jnp.float32)

    content_params = _make_mlp_params(k_pc, input_dim, hidden_dim, 2 * context_latent_dim)
    style_params = _make_mlp_params(k_ps, input_dim, hidden_dim, 2 * style_latent_dim)

    kd1, kd2 = jax.random.split(k_pd)
    delta_w = 0.05 * jax.random.normal(
        kd1, (input_dim, context_latent_dim + style_latent_dim), jnp.float32)
    delta_b = 0.05 * jax.random.normal(
        kd2, (1, context_latent_dim + style_latent_dim), jnp.float32)
    delta_params = (delta_w, delta_b)

    decoder_params = _make_mlp_params(
        k_pdec, context_latent_dim + style_latent_dim, hidden_dim, input_dim)

    raw_params = (content_params, style_params, delta_params, decoder_params)
    # Packing (block_diag / one_hot / bf16 cast) runs ONCE here, outside the per-step path.
    packed = jax.tree_util.tree_map(
        jax.block_until_ready,
        pack_params(content_params, style_params, delta_params, decoder_params, dims))

    # Reparameterization noise: one fused tensor [eps_cc | eps_cs | eps_sc | eps_ss].
    zdim = 2 * (context_latent_dim + style_latent_dim)
    eps_all = jax.random.normal(k_noise, (batch, zdim), jnp.float32)

    out = vae_forward(con, sti, sty, eps_all, packed, dims=dims)
    out = jax.tree_util.tree_map(jax.block_until_ready, out)

    # shape sanity checks
    assert out["real_con_recon"].shape == (batch, input_dim)
    assert out["z_con_con"].shape == (batch, context_latent_dim)
    assert out["delta"].shape == (batch, context_latent_dim + style_latent_dim)
    assert out["real_delta"].shape == (batch, context_latent_dim + style_latent_dim)
    assert bool(jnp.all(out["real_sti_recon"] >= 0.0))  # decoder ends in ReLU

    # numerical check against the unpacked pure-JAX f32 reference (kernel uses bf16 MXU passes)
    ref = _ref_forward(con, sti, sty, raw_params, dims, eps_all)
    for key in ref:
        assert bool(jnp.allclose(out[key], ref[key], rtol=2e-2, atol=2e-2)), f"mismatch: {key}"

    print("KERNEL_OK")
</pallas_src>

<mosaic_0001>
module attributes {stable_mosaic.version = 11 : i64} {
  func.func @_vae_fused_kernel(%arg0: memref<8x128xf32, #tpu.memory_space<vmem>>, %arg1: memref<8x64xf32, #tpu.memory_space<vmem>>, %arg2: memref<8x32xf32, #tpu.memory_space<vmem>>, %arg3: memref<128x256xbf16, #tpu.memory_space<vmem>>, %arg4: memref<1x256xf32, #tpu.memory_space<vmem>>, %arg5: memref<1x256xf32, #tpu.memory_space<vmem>>, %arg6: memref<1x256xf32, #tpu.memory_space<vmem>>, %arg7: memref<256x256xbf16, #tpu.memory_space<vmem>>, %arg8: memref<1x256xf32, #tpu.memory_space<vmem>>, %arg9: memref<1x256xf32, #tpu.memory_space<vmem>>, %arg10: memref<1x256xf32, #tpu.memory_space<vmem>>, %arg11: memref<256x128xbf16, #tpu.memory_space<vmem>>, %arg12: memref<1x128xf32, #tpu.memory_space<vmem>>, %arg13: memref<64x128xbf16, #tpu.memory_space<vmem>>, %arg14: memref<128x256xbf16, #tpu.memory_space<vmem>>, %arg15: memref<1x256xf32, #tpu.memory_space<vmem>>, %arg16: memref<1x256xf32, #tpu.memory_space<vmem>>, %arg17: memref<1x256xf32, #tpu.memory_space<vmem>>, %arg18: memref<256x256xbf16, #tpu.memory_space<vmem>>, %arg19: memref<1x256xf32, #tpu.memory_space<vmem>>, %arg20: memref<1x256xf32, #tpu.memory_space<vmem>>, %arg21: memref<1x256xf32, #tpu.memory_space<vmem>>, %arg22: memref<256x128xbf16, #tpu.memory_space<vmem>>, %arg23: memref<1x128xf32, #tpu.memory_space<vmem>>, %arg24: memref<32x32xbf16, #tpu.memory_space<vmem>>, %arg25: memref<1x32xf32, #tpu.memory_space<vmem>>, %arg26: memref<8x384xf32, #tpu.memory_space<vmem>>) attributes {dimension_semantics = [], scalar_prefetch = 0 : i64, scratch_operands = 0 : i64, tpu.core_type = #tpu.core_type<tc>} {
    %c0 = arith.constant 0 : index
    %c0_0 = arith.constant 0 : index
    %0 = vector.load %arg0[%c0, %c0_0] : memref<8x128xf32, #tpu.memory_space<vmem>>, vector<8x128xf32>
    %1 = arith.truncf %0 : vector<8x128xf32> to vector<8x128xbf16>
    %c0_1 = arith.constant 0 : index
    %c0_2 = arith.constant 0 : index
    %2 = vector.load %arg3[%c0_1, %c0_2] : memref<128x256xbf16, #tpu.memory_space<vmem>>, vector<128x256xbf16>
    %cst = arith.constant dense<0.000000e+00> : vector<8x256xf32>
    %3 = tpu.matmul %1, %2, %cst {dimension_numbers = #tpu.dot_dimension_numbers<[1], [0], [0], [1], [0, 0, 1, 1], [], []>} : vector<8x128xbf16>, vector<128x256xbf16>, vector<8x256xf32> -> vector<8x256xf32>
    %c0_3 = arith.constant 0 : index
    %c0_4 = arith.constant 0 : index
    %4 = vector.load %arg4[%c0_3, %c0_4] : memref<1x256xf32, #tpu.memory_space<vmem>>, vector<1x256xf32>
    %5 = vector.broadcast %4 : vector<1x256xf32> to vector<8x256xf32>
    %6 = arith.addf %3, %5 : vector<8x256xf32>
    %c0_5 = arith.constant 0 : index
    %c0_6 = arith.constant 0 : index
    %7 = vector.load %arg5[%c0_5, %c0_6] : memref<1x256xf32, #tpu.memory_space<vmem>>, vector<1x256xf32>
    %c0_7 = arith.constant 0 : index
    %c0_8 = arith.constant 0 : index
    %8 = vector.load %arg6[%c0_7, %c0_8] : memref<1x256xf32, #tpu.memory_space<vmem>>, vector<1x256xf32>
    %cst_9 = arith.constant dense<0.000000e+00> : vector<256xf32>
    %9 = vector.multi_reduction <add>, %6, %cst_9 [0] : vector<8x256xf32> to vector<256xf32>
    %10 = vector.shape_cast %9 : vector<256xf32> to vector<1x256xf32>
    %cst_10 = arith.constant 8.000000e+00 : f32
    %11 = vector.broadcast %cst_10 : f32 to vector<1x256xf32>
    %12 = arith.divf %10, %11 : vector<1x256xf32>
    %13 = vector.broadcast %12 : vector<1x256xf32> to vector<8x256xf32>
    %14 = arith.subf %6, %13 : vector<8x256xf32>
    %15 = arith.mulf %14, %14 : vector<8x256xf32>
    %cst_11 = arith.constant dense<0.000000e+00> : vector<256xf32>
    %16 = vector.multi_reduction <add>, %15, %cst_11 [0] : vector<8x256xf32> to vector<256xf32>
    %17 = vector.shape_cast %16 : vector<256xf32> to vector<1x256xf32>
    %cst_12 = arith.constant 8.000000e+00 : f32
    %18 = vector.broadcast %cst_12 : f32 to vector<1x256xf32>
    %19 = arith.divf %17, %18 : vector<1x256xf32>
    %20 = vector.broadcast %12 : vector<1x256xf32> to vector<8x256xf32>
    %21 = arith.subf %6, %20 : vector<8x256xf32>
    %cst_13 = arith.constant 9.99999974E-6 : f32
    %22 = vector.broadcast %cst_13 : f32 to vector<1x256xf32>
    %23 = arith.addf %19, %22 : vector<1x256xf32>
    %24 = math.rsqrt %23 : vector<1x256xf32>
    %25 = vector.broadcast %24 : vector<1x256xf32> to vector<8x256xf32>
    %26 = arith.mulf %21, %25 : vector<8x256xf32>
    %27 = vector.broadcast %7 : vector<1x256xf32> to vector<8x256xf32>
    %28 = arith.mulf %26, %27 : vector<8x256xf32>
    %29 = vector.broadcast %8 : vector<1x256xf32> to vector<8x256xf32>
    %30 = arith.addf %28, %29 : vector<8x256xf32>
    %cst_14 = arith.constant 0.000000e+00 : f32
    %31 = vector.broadcast %cst_14 : f32 to vector<8x256xf32>
    %32 = arith.cmpf ogt, %30, %31 : vector<8x256xf32>
    %33 = math.exp %30 : vector<8x256xf32>
    %cst_15 = arith.constant 1.000000e+00 : f32
    %34 = vector.broadcast %cst_15 : f32 to vector<8x256xf32>
    %35 = arith.subf %33, %34 : vector<8x256xf32>
    %36 = arith.select %32, %30, %35 : vector<8x256xi1>, vector<8x256xf32>
    %37 = arith.truncf %36 : vector<8x256xf32> to vector<8x256xbf16>
    %c0_16 = arith.constant 0 : index
    %c0_17 = arith.constant 0 : index
    %38 = vector.load %arg7[%c0_16, %c0_17] : memref<256x256xbf16, #tpu.memory_space<vmem>>, vector<256x256xbf16>
    %cst_18 = arith.constant dense<0.000000e+00> : vector<8x256xf32>
    %39 = tpu.matmul %37, %38, %cst_18 {dimension_numbers = #tpu.dot_dimension_numbers<[1], [0], [0], [1], [0, 0, 1, 1], [], []>} : vector<8x256xbf16>, vector<256x256xbf16>, vector<8x256xf32> -> vector<8x256xf32>
    %c0_19 = arith.constant 0 : index
    %c0_20 = arith.constant 0 : index
    %40 = vector.load %arg8[%c0_19, %c0_20] : memref<1x256xf32, #tpu.memory_space<vmem>>, vector<1x256xf32>
    %41 = vector.broadcast %40 : vector<1x256xf32> to vector<8x256xf32>
    %42 = arith.addf %39, %41 : vector<8x256xf32>
    %c0_21 = arith.constant 0 : index
    %c0_22 = arith.constant 0 : index
    %43 = vector.load %arg9[%c0_21, %c0_22] : memref<1x256xf32, #tpu.memory_space<vmem>>, vector<1x256xf32>
    %c0_23 = arith.constant 0 : index
    %c0_24 = arith.constant 0 : index
    %44 = vector.load %arg10[%c0_23, %c0_24] : memref<1x256xf32, #tpu.memory_space<vmem>>, vector<1x256xf32>
    %cst_25 = arith.constant dense<0.000000e+00> : vector<256xf32>
    %45 = vector.multi_reduction <add>, %42, %cst_25 [0] : vector<8x256xf32> to vector<256xf32>
    %46 = vector.shape_cast %45 : vector<256xf32> to vector<1x256xf32>
    %cst_26 = arith.constant 8.000000e+00 : f32
    %47 = vector.broadcast %cst_26 : f32 to vector<1x256xf32>
    %48 = arith.divf %46, %47 : vector<1x256xf32>
    %49 = vector.broadcast %48 : vector<1x256xf32> to vector<8x256xf32>
    %50 = arith.subf %42, %49 : vector<8x256xf32>
    %51 = arith.mulf %50, %50 : vector<8x256xf32>
    %cst_27 = arith.constant dense<0.000000e+00> : vector<256xf32>
    %52 = vector.multi_reduction <add>, %51, %cst_27 [0] : vector<8x256xf32> to vector<256xf32>
    %53 = vector.shape_cast %52 : vector<256xf32> to vector<1x256xf32>
    %cst_28 = arith.constant 8.000000e+00 : f32
    %54 = vector.broadcast %cst_28 : f32 to vector<1x256xf32>
    %55 = arith.divf %53, %54 : vector<1x256xf32>
    %56 = vector.broadcast %48 : vector<1x256xf32> to vector<8x256xf32>
    %57 = arith.subf %42, %56 : vector<8x256xf32>
    %cst_29 = arith.constant 9.99999974E-6 : f32
    %58 = vector.broadcast %cst_29 : f32 to vector<1x256xf32>
    %59 = arith.addf %55, %58 : vector<1x256xf32>
    %60 = math.rsqrt %59 : vector<1x256xf32>
    %61 = vector.broadcast %60 : vector<1x256xf32> to vector<8x256xf32>
    %62 = arith.mulf %57, %61 : vector<8x256xf32>
    %63 = vector.broadcast %43 : vector<1x256xf32> to vector<8x256xf32>
    %64 = arith.mulf %62, %63 : vector<8x256xf32>
    %65 = vector.broadcast %44 : vector<1x256xf32> to vector<8x256xf32>
    %66 = arith.addf %64, %65 : vector<8x256xf32>
    %cst_30 = arith.constant 0.000000e+00 : f32
    %67 = vector.broadcast %cst_30 : f32 to vector<8x256xf32>
    %68 = arith.cmpf ogt, %66, %67 : vector<8x256xf32>
    %69 = math.exp %66 : vector<8x256xf32>
    %cst_31 = arith.constant 1.000000e+00 : f32
    %70 = vector.broadcast %cst_31 : f32 to vector<8x256xf32>
    %71 = arith.subf %69, %70 : vector<8x256xf32>
    %72 = arith.select %68, %66, %71 : vector<8x256xi1>, vector<8x256xf32>
    %73 = arith.truncf %72 : vector<8x256xf32> to vector<8x256xbf16>
    %c0_32 = arith.constant 0 : index
    %c0_33 = arith.constant 0 : index
    %74 = vector.load %arg11[%c0_32, %c0_33] : memref<256x128xbf16, #tpu.memory_space<vmem>>, vector<256x128xbf16>
    %cst_34 = arith.constant dense<0.000000e+00> : vector<8x128xf32>
    %75 = tpu.matmul %73, %74, %cst_34 {dimension_numbers = #tpu.dot_dimension_numbers<[1], [0], [0], [1], [0, 0, 1, 1], [], []>} : vector<8x256xbf16>, vector<256x128xbf16>, vector<8x128xf32> -> vector<8x128xf32>
    %c0_35 = arith.constant 0 : index
    %c0_36 = arith.constant 0 : index
    %76 = vector.load %arg12[%c0_35, %c0_36] : memref<1x128xf32, #tpu.memory_space<vmem>>, vector<1x128xf32>
    %77 = vector.broadcast %76 : vector<1x128xf32> to vector<8x128xf32>
    %78 = arith.addf %75, %77 : vector<8x128xf32>
    %79 = vector.extract_strided_slice %78 {offsets = [0, 0], sizes = [8, 64], strides = [1, 1]} : vector<8x128xf32> to vector<8x64xf32>
    %80 = vector.extract_strided_slice %78 {offsets = [0, 64], sizes = [8, 64], strides = [1, 1]} : vector<8x128xf32> to vector<8x64xf32>
    %c0_37 = arith.constant 0 : index
    %c0_38 = arith.constant 0 : index
    %81 = vector.load %arg1[%c0_37, %c0_38] : memref<8x64xf32, #tpu.memory_space<vmem>>, vector<8x64xf32>
    %cst_39 = arith.constant 5.000000e-01 : f32
    %82 = vector.broadcast %cst_39 : f32 to vector<8x64xf32>
    %83 = arith.mulf %82, %80 : vector<8x64xf32>
    %84 = math.exp %83 : vector<8x64xf32>
    %85 = arith.mulf %81, %84 : vector<8x64xf32>
    %86 = arith.addf %79, %85 : vector<8x64xf32>
    %87 = arith.truncf %86 : vector<8x64xf32> to vector<8x64xbf16>
    %c0_40 = arith.constant 0 : index
    %c0_41 = arith.constant 0 : index
    %88 = vector.load %arg13[%c0_40, %c0_41] : memref<64x128xbf16, #tpu.memory_space<vmem>>, vector<64x128xbf16>
    %cst_42 = arith.constant dense<0.000000e+00> : vector<8x128xf32>
    %89 = tpu.matmul %87, %88, %cst_42 {dimension_numbers = #tpu.dot_dimension_numbers<[1], [0], [0], [1], [0, 0, 1, 1], [], []>} : vector<8x64xbf16>, vector<64x128xbf16>, vector<8x128xf32> -> vector<8x128xf32>
    %90 = arith.truncf %89 : vector<8x128xf32> to vector<8x128xbf16>
    %c0_43 = arith.constant 0 : index
    %c0_44 = arith.constant 0 : index
    %91 = vector.load %arg14[%c0_43, %c0_44] : memref<128x256xbf16, #tpu.memory_space<vmem>>, vector<128x256xbf16>
    %cst_45 = arith.constant dense<0.000000e+00> : vector<8x256xf32>
    %92 = tpu.matmul %90, %91, %cst_45 {dimension_numbers = #tpu.dot_dimension_numbers<[1], [0], [0], [1], [0, 0, 1, 1], [], []>} : vector<8x128xbf16>, vector<128x256xbf16>, vector<8x256xf32> -> vector<8x256xf32>
    %c0_46 = arith.constant 0 : index
    %c0_47 = arith.constant 0 : index
    %93 = vector.load %arg15[%c0_46, %c0_47] : memref<1x256xf32, #tpu.memory_space<vmem>>, vector<1x256xf32>
    %94 = vector.broadcast %93 : vector<1x256xf32> to vector<8x256xf32>
    %95 = arith.addf %92, %94 : vector<8x256xf32>
    %c0_48 = arith.constant 0 : index
    %c0_49 = arith.constant 0 : index
    %96 = vector.load %arg16[%c0_48, %c0_49] : memref<1x256xf32, #tpu.memory_space<vmem>>, vector<1x256xf32>
    %c0_50 = arith.constant 0 : index
    %c0_51 = arith.constant 0 : index
    %97 = vector.load %arg17[%c0_50, %c0_51] : memref<1x256xf32, #tpu.memory_space<vmem>>, vector<1x256xf32>
    %cst_52 = arith.constant dense<0.000000e+00> : vector<256xf32>
    %98 = vector.multi_reduction <add>, %95, %cst_52 [0] : vector<8x256xf32> to vector<256xf32>
    %99 = vector.shape_cast %98 : vector<256xf32> to vector<1x256xf32>
    %cst_53 = arith.constant 8.000000e+00 : f32
    %100 = vector.broadcast %cst_53 : f32 to vector<1x256xf32>
    %101 = arith.divf %99, %100 : vector<1x256xf32>
    %102 = vector.broadcast %101 : vector<1x256xf32> to vector<8x256xf32>
    %103 = arith.subf %95, %102 : vector<8x256xf32>
    %104 = arith.mulf %103, %103 : vector<8x256xf32>
    %cst_54 = arith.constant dense<0.000000e+00> : vector<256xf32>
    %105 = vector.multi_reduction <add>, %104, %cst_54 [0] : vector<8x256xf32> to vector<256xf32>
    %106 = vector.shape_cast %105 : vector<256xf32> to vector<1x256xf32>
    %cst_55 = arith.constant 8.000000e+00 : f32
    %107 = vector.broadcast %cst_55 : f32 to vector<1x256xf32>
    %108 = arith.divf %106, %107 : vector<1x256xf32>
    %109 = vector.broadcast %101 : vector<1x256xf32> to vector<8x256xf32>
    %110 = arith.subf %95, %109 : vector<8x256xf32>
    %cst_56 = arith.constant 9.99999974E-6 : f32
    %111 = vector.broadcast %cst_56 : f32 to vector<1x256xf32>
    %112 = arith.addf %108, %111 : vector<1x256xf32>
    %113 = math.rsqrt %112 : vector<1x256xf32>
    %114 = vector.broadcast %113 : vector<1x256xf32> to vector<8x256xf32>
    %115 = arith.mulf %110, %114 : vector<8x256xf32>
    %116 = vector.broadcast %96 : vector<1x256xf32> to vector<8x256xf32>
    %117 = arith.mulf %115, %116 : vector<8x256xf32>
    %118 = vector.broadcast %97 : vector<1x256xf32> to vector<8x256xf32>
    %119 = arith.addf %117, %118 : vector<8x256xf32>
    %cst_57 = arith.constant 0.000000e+00 : f32
    %120 = vector.broadcast %cst_57 : f32 to vector<8x256xf32>
    %121 = arith.cmpf ogt, %119, %120 : vector<8x256xf32>
    %122 = math.exp %119 : vector<8x256xf32>
    %cst_58 = arith.constant 1.000000e+00 : f32
    %123 = vector.broadcast %cst_58 : f32 to vector<8x256xf32>
    %124 = arith.subf %122, %123 : vector<8x256xf32>
    %125 = arith.select %121, %119, %124 : vector<8x256xi1>, vector<8x256xf32>
    %126 = arith.truncf %125 : vector<8x256xf32> to vector<8x256xbf16>
    %c0_59 = arith.constant 0 : index
    %c0_60 = arith.constant 0 : index
    %127 = vector.load %arg18[%c0_59, %c0_60] : memref<256x256xbf16, #tpu.memory_space<vmem>>, vector<256x256xbf16>
    %cst_61 = arith.constant dense<0.000000e+00> : vector<8x256xf32>
    %128 = tpu.matmul %126, %127, %cst_61 {dimension_numbers = #tpu.dot_dimension_numbers<[1], [0], [0], [1], [0, 0, 1, 1], [], []>} : vector<8x256xbf16>, vector<256x256xbf16>, vector<8x256xf32> -> vector<8x256xf32>
    %c0_62 = arith.constant 0 : index
    %c0_63 = arith.constant 0 : index
    %129 = vector.load %arg19[%c0_62, %c0_63] : memref<1x256xf32, #tpu.memory_space<vmem>>, vector<1x256xf32>
    %130 = vector.broadcast %129 : vector<1x256xf32> to vector<8x256xf32>
    %131 = arith.addf %128, %130 : vector<8x256xf32>
    %c0_64 = arith.constant 0 : index
    %c0_65 = arith.constant 0 : index
    %132 = vector.load %arg20[%c0_64, %c0_65] : memref<1x256xf32, #tpu.memory_space<vmem>>, vector<1x256xf32>
    %c0_66 = arith.constant 0 : index
    %c0_67 = arith.constant 0 : index
    %133 = vector.load %arg21[%c0_66, %c0_67] : memref<1x256xf32, #tpu.memory_space<vmem>>, vector<1x256xf32>
    %cst_68 = arith.constant dense<0.000000e+00> : vector<256xf32>
    %134 = vector.multi_reduction <add>, %131, %cst_68 [0] : vector<8x256xf32> to vector<256xf32>
    %135 = vector.shape_cast %134 : vector<256xf32> to vector<1x256xf32>
    %cst_69 = arith.constant 8.000000e+00 : f32
    %136 = vector.broadcast %cst_69 : f32 to vector<1x256xf32>
    %137 = arith.divf %135, %136 : vector<1x256xf32>
    %138 = vector.broadcast %137 : vector<1x256xf32> to vector<8x256xf32>
    %139 = arith.subf %131, %138 : vector<8x256xf32>
    %140 = arith.mulf %139, %139 : vector<8x256xf32>
    %cst_70 = arith.constant dense<0.000000e+00> : vector<256xf32>
    %141 = vector.multi_reduction <add>, %140, %cst_70 [0] : vector<8x256xf32> to vector<256xf32>
    %142 = vector.shape_cast %141 : vector<256xf32> to vector<1x256xf32>
    %cst_71 = arith.constant 8.000000e+00 : f32
    %143 = vector.broadcast %cst_71 : f32 to vector<1x256xf32>
    %144 = arith.divf %142, %143 : vector<1x256xf32>
    %145 = vector.broadcast %137 : vector<1x256xf32> to vector<8x256xf32>
    %146 = arith.subf %131, %145 : vector<8x256xf32>
    %cst_72 = arith.constant 9.99999974E-6 : f32
    %147 = vector.broadcast %cst_72 : f32 to vector<1x256xf32>
    %148 = arith.addf %144, %147 : vector<1x256xf32>
    %149 = math.rsqrt %148 : vector<1x256xf32>
    %150 = vector.broadcast %149 : vector<1x256xf32> to vector<8x256xf32>
    %151 = arith.mulf %146, %150 : vector<8x256xf32>
    %152 = vector.broadcast %132 : vector<1x256xf32> to vector<8x256xf32>
    %153 = arith.mulf %151, %152 : vector<8x256xf32>
    %154 = vector.broadcast %133 : vector<1x256xf32> to vector<8x256xf32>
    %155 = arith.addf %153, %154 : vector<8x256xf32>
    %cst_73 = arith.constant 0.000000e+00 : f32
    %156 = vector.broadcast %cst_73 : f32 to vector<8x256xf32>
    %157 = arith.cmpf ogt, %155, %156 : vector<8x256xf32>
    %158 = math.exp %155 : vector<8x256xf32>
    %cst_74 = arith.constant 1.000000e+00 : f32
    %159 = vector.broadcast %cst_74 : f32 to vector<8x256xf32>
    %160 = arith.subf %158, %159 : vector<8x256xf32>
    %161 = arith.select %157, %155, %160 : vector<8x256xi1>, vector<8x256xf32>
    %162 = arith.truncf %161 : vector<8x256xf32> to vector<8x256xbf16>
    %c0_75 = arith.constant 0 : index
    %c0_76 = arith.constant 0 : index
    %163 = vector.load %arg22[%c0_75, %c0_76] : memref<256x128xbf16, #tpu.memory_space<vmem>>, vector<256x128xbf16>
    %cst_77 = arith.constant dense<0.000000e+00> : vector<8x128xf32>
    %164 = tpu.matmul %162, %163, %cst_77 {dimension_numbers = #tpu.dot_dimension_numbers<[1], [0], [0], [1], [0, 0, 1, 1], [], []>} : vector<8x256xbf16>, vector<256x128xbf16>, vector<8x128xf32> -> vector<8x128xf32>
    %c0_78 = arith.constant 0 : index
    %c0_79 = arith.constant 0 : index
    %165 = vector.load %arg23[%c0_78, %c0_79] : memref<1x128xf32, #tpu.memory_space<vmem>>, vector<1x128xf32>
    %166 = vector.broadcast %165 : vector<1x128xf32> to vector<8x128xf32>
    %167 = arith.addf %164, %166 : vector<8x128xf32>
    %cst_80 = arith.constant 0.000000e+00 : f32
    %168 = vector.broadcast %cst_80 : f32 to vector<8x128xf32>
    %169 = arith.maximumf %167, %168 : vector<8x128xf32>
    %c0_81 = arith.constant 0 : index
    %c0_82 = arith.constant 0 : index
    %170 = vector.load %arg2[%c0_81, %c0_82] : memref<8x32xf32, #tpu.memory_space<vmem>>, vector<8x32xf32>
    %171 = arith.truncf %170 : vector<8x32xf32> to vector<8x32xbf16>
    %c0_83 = arith.constant 0 : index
    %c0_84 = arith.constant 0 : index
    %172 = vector.load %arg24[%c0_83, %c0_84] : memref<32x32xbf16, #tpu.memory_space<vmem>>, vector<32x32xbf16>
    %cst_85 = arith.constant dense<0.000000e+00> : vector<8x32xf32>
    %173 = tpu.matmul %171, %172, %cst_85 {dimension_numbers = #tpu.dot_dimension_numbers<[1], [0], [0], [1], [0, 0, 1, 1], [], []>} : vector<8x32xbf16>, vector<32x32xbf16>, vector<8x32xf32> -> vector<8x32xf32>
    %c0_86 = arith.constant 0 : index
    %c0_87 = arith.constant 0 : index
    %174 = vector.load %arg25[%c0_86, %c0_87] : memref<1x32xf32, #tpu.memory_space<vmem>>, vector<1x32xf32>
    %175 = vector.broadcast %174 : vector<1x32xf32> to vector<8x32xf32>
    %176 = arith.addf %173, %175 : vector<8x32xf32>
    %177 = vector.extract_strided_slice %86 {offsets = [0, 32], sizes = [8, 32], strides = [1, 1]} : vector<8x64xf32> to vector<8x32xf32>
    %178 = vector.extract_strided_slice %86 {offsets = [0, 0], sizes = [8, 32], strides = [1, 1]} : vector<8x64xf32> to vector<8x32xf32>
    %179 = arith.subf %177, %178 : vector<8x32xf32>
    %180 = tpu.concatenate %86, %79 in 1 : vector<8x64xf32>, vector<8x64xf32> -> vector<8x128xf32>
    %c0_88 = arith.constant 0 : index
    %c0_89 = arith.constant 0 : index
    %181 = vector.load %arg26[%c0_88, %c0_89] : memref<8x384xf32, #tpu.memory_space<vmem>>, vector<8x128xf32>
    tpu.vector_store %arg26[%c0_88, %c0_89], %180 {strides = array<i32>} : memref<8x384xf32, #tpu.memory_space<vmem>>, vector<8x128xf32>,
    %182 = tpu.concatenate %80, %176, %179 in 1 : vector<8x64xf32>, vector<8x32xf32>, vector<8x32xf32> -> vector<8x128xf32>
    %c0_90 = arith.constant 0 : index
    %c128 = arith.constant 128 : index
    %183 = vector.load %arg26[%c0_90, %c128] : memref<8x384xf32, #tpu.memory_space<vmem>>, vector<8x128xf32>
    tpu.vector_store %arg26[%c0_90, %c128], %182 {strides = array<i32>} : memref<8x384xf32, #tpu.memory_space<vmem>>, vector<8x128xf32>,
    %c0_91 = arith.constant 0 : index
    %c256 = arith.constant 256 : index
    %184 = vector.load %arg26[%c0_91, %c256] : memref<8x384xf32, #tpu.memory_space<vmem>>, vector<8x128xf32>
    tpu.vector_store %arg26[%c0_91, %c256], %169 {strides = array<i32>} : memref<8x384xf32, #tpu.memory_space<vmem>>, vector<8x128xf32>,
    return
  }
}

</mosaic_0001>

<bundles_post_ra>
// kernel: vae_forward.1
= control target key start
LH: loop header
LB: loop body
LE: loop exit
PB: predicated region body
PF: predicated region fallthrough
CT: control target
= control target key end

     0   :  { %s3518_s0 = inlined_call_operand.vmem [shape: f32[8,128], index: 0, kind: input, shape index: {}]   ;;  %s3519_s1 = inlined_call_operand.hbm [shape: f32[8,64], index: 1, kind: input, shape index: {}]   ;;  %s3520_s2 = inlined_call_operand.hbm [shape: f32[8,32], index: 2, kind: input, shape index: {}]   ;;  %s3521_s3 = inlined_call_operand.hbm [shape: bf16[128,256], index: 3, kind: input, shape index: {}]   ;;  %s3522_s4 = inlined_call_operand.hbm [shape: f32[1,256], index: 4, kind: input, shape index: {}]   ;;  %s3523_s5 = inlined_call_operand.hbm [shape: f32[1,256], index: 5, kind: input, shape index: {}]   ;;  %s3524_s6 = inlined_call_operand.hbm [shape: f32[1,256], index: 6, kind: input, shape index: {}]   ;;  %s3525_s7 = inlined_call_operand.hbm [shape: bf16[256,256], index: 7, kind: input, shape index: {}]   ;;  %s3526_s8 = inlined_call_operand.hbm [shape: f32[1,256], index: 8, kind: input, shape index: {}]   ;;  %s3527_s9 = inlined_call_operand.hbm [shape: f32[1,256], index: 9, kind: input, shape index: {}]   ;;  %s3528_s10 = inlined_call_operand.hbm [shape: f32[1,256], index: 10, kind: input, shape index: {}]   ;;  %s3529_s11 = inlined_call_operand.hbm [shape: bf16[256,128], index: 11, kind: input, shape index: {}]   ;;  %s3530_s12 = inlined_call_operand.hbm [shape: f32[1,128], index: 12, kind: input, shape index: {}]   ;;  %s3531_s13 = inlined_call_operand.vmem [shape: bf16[64,128], index: 13, kind: input, shape index: {}]   ;;  %s3532_s14 = inlined_call_operand.hbm [shape: bf16[128,256], index: 14, kind: input, shape index: {}]   ;;  %s3533_s15 = inlined_call_operand.hbm [shape: f32[1,256], index: 15, kind: input, shape index: {}]   ;;  %s3534_s16 = inlined_call_operand.hbm [shape: f32[1,256], index: 16, kind: input, shape index: {}]   ;;  %s3535_s17 = inlined_call_operand.hbm [shape: f32[1,256], index: 17, kind: input, shape index: {}]   ;;  %s3536_s18 = inlined_call_operand.hbm [shape: bf16[256,256], index: 18, kind: input, shape index: {}]   ;;  %s3537_s19 = inlined_call_operand.hbm [shape: f32[1,256], index: 19, kind: input, shape index: {}]   ;;  %s3538_s20 = inlined_call_operand.vmem [shape: f32[1,256], index: 20, kind: input, shape index: {}]   ;;  %s3539_s21 = inlined_call_operand.hbm [shape: f32[1,256], index: 21, kind: input, shape index: {}]   ;;  %s3540_s22 = inlined_call_operand.hbm [shape: bf16[256,128], index: 22, kind: input, shape index: {}]   ;;  %s3541_s23 = inlined_call_operand.vmem [shape: f32[1,128], index: 23, kind: input, shape index: {}]   ;;  %s3542_s24 = inlined_call_operand.vmem [shape: bf16[32,32], index: 24, kind: input, shape index: {}]   ;;  %s3543_s25 = inlined_call_operand.vmem [shape: f32[1,32], index: 25, kind: input, shape index: {}]   ;;  %s3544_s26 = inlined_call_operand.vmem [shape: f32[8,384], index: 26, kind: output, shape index: {}]  }
   0x1   :  { %3545 = sst [smem:[#allocation44_spill]] %s3518_s0 }
   0x2   :  { %3546 = sst [smem:[#allocation45_spill]] %s3519_s1 }
   0x3   :  { %3547 = sst [smem:[#allocation46_spill]] %s3520_s2 }
   0x4   :  { %3548 = sst [smem:[#allocation47_spill]] %s3521_s3 }
   0x5   :  { %3549 = sst [smem:[#allocation48_spill]] %s3522_s4 }
   0x6   :  { %3550 = sst [smem:[#allocation49_spill]] %s3523_s5 }
   0x7   :  { %3551 = sst [smem:[#allocation50_spill]] %s3524_s6 }
   0x8   :  { %3552 = sst [smem:[#allocation51_spill]] %s3525_s7 }
   0x9   :  { %3553 = sst [smem:[#allocation52_spill]] %s3526_s8 }
   0xa   :  { %3554 = sst [smem:[#allocation53_spill]] %s3527_s9 }
   0xb   :  { %3555 = sst [smem:[#allocation54_spill]] %s3528_s10 }
   0xc   :  { %3556 = sst [smem:[#allocation55_spill]] %s3538_s20 }
   0xd   :  { %3557 = sst [smem:[#allocation56_spill]] %s3541_s23 }
   0xe   :  { %3558 = sst [smem:[#allocation57_spill]] %s3543_s25 }
   0xf   :  { %31 = vsyncpa [#allocation3], 0 }
  0x10   :  { %32 = vsyncpa [#allocation5], 0 }
  0x11   :  { %33 = vsyncpa [#allocation8], 0 }
  0x12   :  { %34 = vsyncpa [#allocation11], 0 }
  0x13   :  { %35 = vsyncpa [#allocation14], 0 }
  0x14   :  { %36 = vsyncpa [#allocation17], 0 }
  0x15   :  { %37 = vsyncpa [#allocation20], 0 }
  0x16   :  { %38 = vsyncpa [#allocation23], 0 }
  0x17   :  { %39 = vsyncpa [#allocation26], 0 }
  0x18   :  { %40 = vsyncpa [#allocation29], 0  ;;  %s3559_s7 = sld [smem:[#allocation46_spill]] }
  0x1e   :  { %s60_s28 = sshll.u32 %s3559_s7, 4  ;;  %s61_s28 = int_to_ptr.hbm [resolvable:$true] %s60_s28 }
  0x1f   :  { %41 = vsyncpa [#allocation32], 0  ;;  %s3171_s8 = smov [#allocation4]   ;;  %s3560_s9 = sld [smem:[#allocation48_spill]] }
  0x20   :  { %s62_s4 = sshll.u32 %s3171_s8, 4  ;;  %s3172_s2 = smov [#allocation7]   ;;  %s63_s4 = int_to_ptr.vmem [resolvable:$true] %s62_s4 }
  0x21   :  { %65 = dma.hbm_to_vmem [thread:$0]  %s61_s28, 128, %s63_s4, [#allocation5]  }
  0x22   :  { %s86_s5 = sshll.u32 %s3172_s2, 4  ;;  %s3561_s1 = sld [smem:[#allocation50_spill]]  ;;  %s87_s5 = int_to_ptr.vmem [resolvable:$true] %s86_s5 }
  0x23   :  { %s3562_s7 = sld [smem:[#allocation52_spill]]  ;;  %s3173_s20 = smov [#allocation10]  }
  0x24   :  { %s108_s25 = sshll.u32 %s3173_s20, 4  ;;  %s3174_s28 = smov [#allocation13]   ;;  %s109_s25 = int_to_ptr.vmem [resolvable:$true] %s108_s25 }
  0x25   :  { %s84_s30 = sshll.u32 %s3560_s9, 4  ;;  %s132_s4 = sshll.u32 %s3174_s28, 4  ;;  %s85_s30 = int_to_ptr.hbm [resolvable:$true] %s84_s30  ;;  %s133_s4 = int_to_ptr.vmem [resolvable:$true] %s132_s4 }
  0x26   :  { %89 = dma.hbm_to_vmem [thread:$0]  %s85_s30, 32, %s87_s5, [#allocation8]  }
  0x27   :  { %s3563_s9 = sld [smem:[#allocation54_spill]]  ;;  %s176_s5 = sshll.u32 %s3530_s12, 4  ;;  %s177_s5 = int_to_ptr.hbm [resolvable:$true] %s176_s5 }
  0x28   :  { %s106_s23 = sshll.u32 %s3561_s1, 4  ;;  %s3175_s6 = smov [#allocation16]   ;;  %s107_s23 = int_to_ptr.hbm [resolvable:$true] %s106_s23 }
  0x29   :  { %s130_s8 = sshll.u32 %s3562_s7, 4  ;;  %s154_s1 = sshll.u32 %s3175_s6, 4  ;;  %s131_s8 = int_to_ptr.hbm [resolvable:$true] %s130_s8  ;;  %s155_s1 = int_to_ptr.vmem [resolvable:$true] %s154_s1 }
  0x2a   :  { %111 = dma.hbm_to_vmem [thread:$0]  %s107_s23, 32, %s109_s25, [#allocation11]  }
  0x2b   :  { %135 = dma.hbm_to_vmem [thread:$0]  %s131_s8, 32, %s133_s4, [#allocation14]  }
  0x2c   :  { %s3176_s20 = smov [#allocation19]   ;;  %s202_s3 = sshll.u32 %s3533_s15, 4  ;;  %s203_s3 = int_to_ptr.hbm [resolvable:$true] %s202_s3 }
  0x2d   :  { %s152_s2 = sshll.u32 %s3563_s9, 4  ;;  %s178_s23 = sshll.u32 %s3176_s20, 4  ;;  %s153_s2 = int_to_ptr.hbm [resolvable:$true] %s152_s2  ;;  %s179_s23 = int_to_ptr.vmem [resolvable:$true] %s178_s23 }
  0x2e   :  { %157 = dma.hbm_to_vmem [thread:$0]  %s153_s2, 32, %s155_s1, [#allocation17]  }
  0x2f   :  { %181 = dma.hbm_to_vmem [thread:$0]  %s177_s5, 16, %s179_s23, [#allocation20]  }
  0x30   :  { %s224_s28 = sshll.u32 %s3535_s17, 4  ;;  %s3177_s4 = smov [#allocation22]   ;;  %s225_s28 = int_to_ptr.hbm [resolvable:$true] %s224_s28 }
  0x31   :  { %s204_s12 = sshll.u32 %s3177_s4, 4  ;;  %s3178_s29 = smov [#allocation25]   ;;  %s205_s12 = int_to_ptr.vmem [resolvable:$true] %s204_s12 }
  0x32   :  { %207 = dma.hbm_to_vmem [thread:$0]  %s203_s3, 32, %s205_s12, [#allocation23]  }
  0x33   :  { %s226_s0 = sshll.u32 %s3178_s29, 4  ;;  %s248_s10 = sshll.u32 %s3537_s19, 4  ;;  %s227_s0 = int_to_ptr.vmem [resolvable:$true] %s226_s0  ;;  %s249_s10 = int_to_ptr.hbm [resolvable:$true] %s248_s10 }
  0x34   :  { %229 = dma.hbm_to_vmem [thread:$0]  %s225_s28, 32, %s227_s0, [#allocation26]  }
  0x35   :  { %s3564_s5 = sld [smem:[#allocation45_spill]]  ;;  %s3179_s1 = smov [#allocation28]  }
  0x36   :  { %s250_s17 = sshll.u32 %s3179_s1, 4  ;;  %s3180_s20 = smov [#allocation2]   ;;  %s251_s17 = int_to_ptr.vmem [resolvable:$true] %s250_s17 }
  0x37   :  { %253 = dma.hbm_to_vmem [thread:$0]  %s249_s10, 32, %s251_s17, [#allocation29]  }
  0x38   :  { %s51_s23 = sshll.u32 %s3180_s20, 4  ;;  %s3565_s3 = sld [smem:[#allocation47_spill]]  ;;  %s52_s23 = int_to_ptr.vmem [resolvable:$true] %s51_s23 }
  0x39   :  { %s3181_s19 = smov [#allocation6]   ;;  %s3566_s12 = sld [smem:[#allocation49_spill]] }
  0x3a   :  { %s72_s8 = sshll.u32 %s3181_s19, 4  ;;  %s3182_s0 = smov 128   ;;  %s73_s8 = int_to_ptr.vmem [resolvable:$true] %s72_s8 }
  0x3b   :  { %s49_s6 = sshll.u32 %s3564_s5, 4  ;;  %s3183_s9 = smov 8   ;;  %s50_s6 = int_to_ptr.hbm [resolvable:$true] %s49_s6 }
  0x3c   :  { %54 = dma.hbm_to_vmem [thread:$0]  %s50_s6, 128, %s52_s23, [#allocation3]  }
  0x3d   :  { %s3184_s2 = smov [#allocation9]   ;;  %s3567_s5 = sld [smem:[#allocation51_spill]] }
  0x3e   :  { %s70_s7 = sshll.u32 %s3565_s3, 4  ;;  %s97_s10 = sshll.u32 %s3184_s2, 4  ;;  %s71_s7 = int_to_ptr.hbm [resolvable:$true] %s70_s7  ;;  %s98_s10 = int_to_ptr.vmem [resolvable:$true] %s97_s10 }
  0x3f   :  { %s95_s29 = sshll.u32 %s3566_s12, 4  ;;  %s3568_s20 = sld [smem:[#allocation53_spill]]  ;;  %s96_s29 = int_to_ptr.hbm [resolvable:$true] %s95_s29 }
  0x40   :  { %78 = dma.hbm_to_vmem [thread:$0]  %s71_s7, 2048, %s73_s8, [#allocation5], %s3182_s0, %s3182_s0, %s3183_s9  }
  0x41   :  { %100 = dma.hbm_to_vmem [thread:$0]  %s96_s29, 32, %s98_s10, [#allocation8]  }
  0x42   :  { %s3185_s25 = smov [#allocation12]   ;;  %s3186_s3 = smov [#allocation15]  }
  0x43   :  { %s116_s6 = sshll.u32 %s3567_s5, 4  ;;  %s118_s27 = sshll.u32 %s3185_s25, 4  ;;  %s117_s6 = int_to_ptr.hbm [resolvable:$true] %s116_s6  ;;  %s119_s27 = int_to_ptr.vmem [resolvable:$true] %s118_s27 }
  0x44   :  { %124 = dma.hbm_to_vmem [thread:$0]  %s117_s6, 4096, %s119_s27, [#allocation11], %s3182_s0, %s3182_s0, %s3183_s9  }
  0x45   :  { %s141_s23 = sshll.u32 %s3568_s20, 4  ;;  %s143_s7 = sshll.u32 %s3186_s3, 4  ;;  %s142_s23 = int_to_ptr.hbm [resolvable:$true] %s141_s23  ;;  %s144_s7 = int_to_ptr.vmem [resolvable:$true] %s143_s7 }
  0x46   :  { %s162_s28 = sshll.u32 %s3529_s11, 4  ;;  %s3187_s4 = smov [#allocation18]   ;;  %s163_s28 = int_to_ptr.hbm [resolvable:$true] %s162_s28 }
  0x47   :  { %146 = dma.hbm_to_vmem [thread:$0]  %s142_s23, 32, %s144_s7, [#allocation14]  }
  0x48   :  { %s164_s12 = sshll.u32 %s3187_s4, 4  ;;  %s188_s10 = sshll.u32 %s3532_s14, 4  ;;  %s165_s12 = int_to_ptr.vmem [resolvable:$true] %s164_s12  ;;  %s189_s10 = int_to_ptr.hbm [resolvable:$true] %s188_s10 }
  0x49   :  { %s3188_s15 = smov 64   ;;  %s3189_s30 = smov 4  }
  0x4a   :  { %170 = dma.hbm_to_vmem [thread:$0]  %s163_s28, 2048, %s165_s12, [#allocation17], %s3188_s15, %s3188_s15, %s3189_s30  }
  0x4b   :  { %s3190_s5 = smov [#allocation21]   ;;  %s213_s17 = sshll.u32 %s3534_s16, 4  ;;  %s214_s17 = int_to_ptr.hbm [resolvable:$true] %s213_s17 }
  0x4c   :  { %s190_s6 = sshll.u32 %s3190_s5, 4  ;;  %s234_s23 = sshll.u32 %s3536_s18, 4  ;;  %s191_s6 = int_to_ptr.vmem [resolvable:$true] %s190_s6  ;;  %s235_s23 = int_to_ptr.hbm [resolvable:$true] %s234_s23 }
  0x4d   :  { %196 = dma.hbm_to_vmem [thread:$0]  %s189_s10, 2048, %s191_s6, [#allocation20], %s3182_s0, %s3182_s0, %s3183_s9  }
  0x4e   :  { %s3191_s25 = smov [#allocation24]   ;;  %s3192_s3 = smov [#allocation27]  }
  0x4f   :  { %s215_s27 = sshll.u32 %s3191_s25, 4  ;;  %s236_s7 = sshll.u32 %s3192_s3, 4  ;;  %s216_s27 = int_to_ptr.vmem [resolvable:$true] %s215_s27  ;;  %s237_s7 = int_to_ptr.vmem [resolvable:$true] %s236_s7 }
  0x50   :  { %218 = dma.hbm_to_vmem [thread:$0]  %s214_s17, 32, %s216_s27, [#allocation23]  }
  0x51   :  { %s261_s16 = sshll.u32 %s3539_s21, 4  ;;  %s271_s18 = sshll.u32 %s3540_s22, 4  ;;  %s262_s16 = int_to_ptr.hbm [resolvable:$true] %s261_s16  ;;  %s272_s18 = int_to_ptr.hbm [resolvable:$true] %s271_s18 }
  0x52   :  { %242 = dma.hbm_to_vmem [thread:$0]  %s235_s23, 4096, %s237_s7, [#allocation26], %s3182_s0, %s3182_s0, %s3183_s9  }
  0x53   :  { %s3193_s12 = smov [#allocation30]   ;;  %s3194_s2 = smov [#allocation31]  }
  0x54   :  { %s263_s29 = sshll.u32 %s3193_s12, 4  ;;  %s273_s10 = sshll.u32 %s3194_s2, 4  ;;  %s264_s29 = int_to_ptr.vmem [resolvable:$true] %s263_s29  ;;  %s274_s10 = int_to_ptr.vmem [resolvable:$true] %s273_s10 }
  0x55   :  { %266 = dma.hbm_to_vmem [thread:$0]  %s262_s16, 32, %s264_s29, [#allocation29]  }
  0x56   :  { %279 = dma.hbm_to_vmem [thread:$0]  %s272_s18, 2048, %s274_s10, [#allocation32], %s3188_s15, %s3188_s15, %s3189_s30  }
  0x57   :  { %3149 = dma.done.wait [#allocation3], 128  }
  0x58   :  { %3150 = vsyncadd [#allocation3], 4294967168 }
  0x59   :  { %3151 = dma.done.wait [#allocation5], 2176  }
  0x5a   :  { %3152 = vsyncadd [#allocation5], 4294965120 }
  0x5b   :  { %3153 = dma.done.wait [#allocation8], 64  }
  0x5c   :  { %3154 = vsyncadd [#allocation8], 4294967232 }
  0x5d   :  { %3155 = dma.done.wait [#allocation11], 4128  }
  0x5e   :  { %3156 = vsyncadd [#allocation11], 4294963168 }
  0x5f   :  { %3157 = dma.done.wait [#allocation14], 64  }
  0x60   :  { %3158 = vsyncadd [#allocation14], 4294967232 }
  0x61   :  { %3159 = dma.done.wait [#allocation17], 2080  }
  0x62   :  { %3160 = vsyncadd [#allocation17], 4294965216 }
  0x63   :  { %3161 = dma.done.wait [#allocation20], 2064  }
  0x64   :  { %3162 = vsyncadd [#allocation20], 4294965232 }
  0x65   :  { %3163 = dma.done.wait [#allocation23], 64  }
  0x66   :  { %3164 = vsyncadd [#allocation23], 4294967232 }
  0x67   :  { %3165 = dma.done.wait [#allocation26], 4128  }
  0x68   :  { %3166 = vsyncadd [#allocation26], 4294963168 }
  0x69   :  { %3167 = dma.done.wait [#allocation29], 64  }
  0x6a   :  { %3168 = vsyncadd [#allocation29], 4294967232 }
  0x6b   :  { %3169 = dma.done.wait [#allocation32], 2048  }
  0x6c   :  { %3170 = vsyncadd [#allocation32], 4294965248  ;;  %v1982_v0 = vld [vmem:[#allocation6 + $0x70] sm:$0xf]  ;;  %v2485_v1 = vld [vmem:[#allocation6 + $0x74] sm:$0xf0] }
  0x6d   :  { %v2484_v2 = vld [vmem:[#allocation6 + $0x74] sm:$0xf]  ;;  %v1983_v3 = vor.u32 %v2485_v1, %v1982_v0  ;;  %v1984_v4 = vld [vmem:[#allocation6 + $0x78] sm:$0xf0]  ;;  %v1974_v5 = vld [vmem:[#allocation6 + $0x60] sm:$0xf] }
  0x6e   :  { %v2483_v6 = vld [vmem:[#allocation6 + $0x64] sm:$0xf0]  ;;  %v1987_v7 = vor.u32 %v2484_v2, %v1984_v4  ;;  %v2482_v8 = vld [vmem:[#allocation6 + $0x64] sm:$0xf]  ;;  %v1976_v9 = vld [vmem:[#allocation6 + $0x68] sm:$0xf0] }
  0x6f   :  { %471 = vmatpush.bf16.msra.mxu0 %v1983_v3  ;;  %v1975_v10 = vor.u32 %v2483_v6, %v1974_v5  ;;  %v1979_v11 = vor.u32 %v2482_v8, %v1976_v9  ;;  %v1966_v12 = vld [vmem:[#allocation6 + $0x50] sm:$0xf]  ;;  %v2481_v13 = vld [vmem:[#allocation6 + $0x54] sm:$0xf0]  ;;  %v2480_v14 = vld [vmem:[#allocation6 + $0x54] sm:$0xf] }
  0x70   :  { %484 = vmatpush.bf16.msra.mxu1 %v1987_v7  ;;  %v1968_v15 = vld [vmem:[#allocation6 + $0x58] sm:$0xf0]  ;;  %v1967_v16 = vor.u32 %v2481_v13, %v1966_v12  ;;  %v1958_v18 = vld [vmem:[#allocation6 + $0x40] sm:$0xf]  ;;  %v2479_v19 = vld [vmem:[#allocation6 + $0x44] sm:$0xf0] }
  0x71   :  { %v1971_v17 = vor.u32 %v2480_v14, %v1968_v15  ;;  %v2478_v20 = vld [vmem:[#allocation6 + $0x44] sm:$0xf]  ;;  %v1960_v21 = vld [vmem:[#allocation6 + $0x48] sm:$0xf0]  ;;  %v1959_v22 = vor.u32 %v2479_v19, %v1958_v18  ;;  %v1950_v24 = vld [vmem:[#allocation6 + $0x30] sm:$0xf] }
  0x72   :  { %v1963_v23 = vor.u32 %v2478_v20, %v1960_v21  ;;  %v2477_v25 = vld [vmem:[#allocation6 + $0x34] sm:$0xf0]  ;;  %v2476_v26 = vld [vmem:[#allocation6 + $0x34] sm:$0xf]  ;;  %v1952_v27 = vld [vmem:[#allocation6 + $0x38] sm:$0xf0] }
  0x73   :  { %472 = vmatpush.bf16.msra.mxu0 %v1975_v10  ;;  %v1951_v28 = vor.u32 %v2477_v25, %v1950_v24  ;;  %v1955_v29 = vor.u32 %v2476_v26, %v1952_v27  ;;  %v1942_v30 = vld [vmem:[#allocation6 + $0x20] sm:$0xf]  ;;  %v2475_v31 = vld [vmem:[#allocation6 + $0x24] sm:$0xf0]  ;;  %v2474_v32 = vld [vmem:[#allocation6 + $0x24] sm:$0xf] }
  0x74   :  { %485 = vmatpush.bf16.msra.mxu1 %v1979_v11  ;;  %v1944_v33 = vld [vmem:[#allocation6 + $0x28] sm:$0xf0]  ;;  %v1943_v34 = vor.u32 %v2475_v31, %v1942_v30  ;;  %v1934_v36 = vld [vmem:[#allocation6 + $0x10] sm:$0xf]  ;;  %v2473_v37 = vld [vmem:[#allocation6 + $0x14] sm:$0xf0] }
  0x75   :  { %v1947_v35 = vor.u32 %v2474_v32, %v1944_v33  ;;  %v2472_v38 = vld [vmem:[#allocation6 + $0x14] sm:$0xf]  ;;  %v1936_v39 = vld [vmem:[#allocation6 + $0x18] sm:$0xf0]  ;;  %v1935_v40 = vor.u32 %v2473_v37, %v1934_v36  ;;  %v1926_v42 = vld [vmem:[#allocation6] sm:$0xf] }
  0x76   :  { %v1939_v41 = vor.u32 %v2472_v38, %v1936_v39  ;;  %v2471_v43 = vld [vmem:[#allocation6 + $0x4] sm:$0xf0]  ;;  %v2470_v44 = vld [vmem:[#allocation6 + $0x4] sm:$0xf]  ;;  %v1928_v45 = vld [vmem:[#allocation6 + $0x8] sm:$0xf0] }
  0x77   :  { %473 = vmatpush.bf16.msra.mxu0 %v1967_v16  ;;  %v1927_v46 = vor.u32 %v2471_v43, %v1926_v42  ;;  %s3569_s0 = sld [smem:[#allocation44_spill]]  ;;  %v1931_v48 = vor.u32 %v2470_v44, %v1928_v45  ;;  %v3195_v50 = vmov 8.0   ;;  %v385_v52 = vld [vmem:[#allocation7] sm:$0x3]  ;;  %v2048_v9 = vld [vmem:[#allocation12 + $0x70] sm:$0xf] }
  0x78   :  { %486 = vmatpush.bf16.msra.mxu1 %v1971_v17  ;;  %2633 = vrcp.f32 %v3195_v50  ;;  %v387_v54 = vperm.slane %v385_v52, 0  ;;  %v388_v55 = vperm.slane %v385_v52, 1  ;;  %v2501_v10 = vld [vmem:[#allocation12 + $0x74] sm:$0xf0]  ;;  %v2112_v11 = vld [vmem:[#allocation12 + $0xf0] sm:$0xf] }
  0x79   :  { %v2049_v13 = vor.u32 %v2501_v10, %v2048_v9  ;;  %v2517_v14 = vld [vmem:[#allocation12 + $0xf4] sm:$0xf0]  ;;  %v2500_v15 = vld [vmem:[#allocation12 + $0x74] sm:$0xf]  ;;  %v2050_v19 = vld [vmem:[#allocation12 + $0x78] sm:$0xf0] }
  0x7a   :  { %v2113_v18 = vor.u32 %v2517_v14, %v2112_v11  ;;  %v2516_v20 = vld [vmem:[#allocation12 + $0xf4] sm:$0xf]  ;;  %v2040_v26 = vld [vmem:[#allocation12 + $0x60] sm:$0xf]  ;;  %v2499_v27 = vld [vmem:[#allocation12 + $0x64] sm:$0xf0] }
  0x7b   :  { %474 = vmatpush.bf16.msra.mxu0 %v1959_v22  ;;  %786 = vmatpush.bf16.msra.mxu2 %v2049_v13  ;;  %v2053_v22 = vor.u32 %v2500_v15, %v2050_v19  ;;  %v2041_v30 = vor.u32 %v2499_v27, %v2040_v26  ;;  %v2515_v31 = vld [vmem:[#allocation12 + $0xe4] sm:$0xf0]  ;;  %v2498_v32 = vld [vmem:[#allocation12 + $0x64] sm:$0xf]  ;;  %v2042_v33 = vld [vmem:[#allocation12 + $0x68] sm:$0xf0] }
  0x7c   :  { %487 = vmatpush.bf16.msra.mxu1 %v1963_v23  ;;  %v2114_v23 = vld [vmem:[#allocation12 + $0xf8] sm:$0xf0]  ;;  %799 = vmatpush.bf16.msra.mxu3 %v2113_v18  ;;  %v2045_v36 = vor.u32 %v2498_v32, %v2042_v33  ;;  %v2514_v37 = vld [vmem:[#allocation12 + $0xe4] sm:$0xf]  ;;  %v2106_v38 = vld [vmem:[#allocation12 + $0xe8] sm:$0xf0] }
  0x7d   :  { %v367_v47 = vld [vmem:[%s3569_s0] sm:$0xff]  ;;  %v2117_v25 = vor.u32 %v2516_v20, %v2114_v23  ;;  %v2497_v43 = vld [vmem:[#allocation12 + $0x54] sm:$0xf0]  ;;  %v2492_v18 = vld [vmem:[#allocation12 + $0x34] sm:$0xf]  ;;  %s3570_s8 = sld [smem:[#allocation57_spill]] }
  0x7e   :  { %v368_v49 = vpack.c.bf16 %v367_v47, %v367_v47  ;;  %v2634_v51 = vpop.eup %2633  ;;  %v2032_v42 = vld [vmem:[#allocation12 + $0x50] sm:$0xf]  ;;  %v2513_v47 = vld [vmem:[#allocation12 + $0xd4] sm:$0xf0]  ;;  %v2018_v19 = vld [vmem:[#allocation12 + $0x38] sm:$0xf0] }
  0x7f   :  { %475 = vmatpush.bf16.msra.mxu0 %v1951_v28  ;;  %v512_v53 = vmul.f32 8.0, %v2634_v51  ;;  %vm516_vm0 = vweird.f32 %v2634_v51  ;;  %v2104_v28 = vld [vmem:[#allocation12 + $0xe0] sm:$0xf]  ;;  %787 = vmatpush.bf16.msra.mxu2 %v2041_v30  ;;  %v2096_v44 = vld [vmem:[#allocation12 + $0xd0] sm:$0xf]  ;;  %s3571_s28 = sld [smem:[#allocation55_spill]] }
  0x80   :  { %488 = vmatpush.bf16.msra.mxu1 %v1955_v29  ;;  %v2016_v9 = vld [vmem:[#allocation12 + $0x30] sm:$0xf]  ;;  %v2493_v10 = vld [vmem:[#allocation12 + $0x34] sm:$0xf0]  ;;  %v2508_v20 = vld [vmem:[#allocation12 + $0xb4] sm:$0xf] }
  0x81   :  { %v513_v57 = vsub.f32 1.0, %v512_v53  ;;  %v2512_v53 = vld [vmem:[#allocation12 + $0xd4] sm:$0xf]  ;;  %v2080_v13 = vld [vmem:[#allocation12 + $0xb0] sm:$0xf]  ;;  %s3572_s2 = sld [smem:[#allocation56_spill]] }
  0x82   :  { %v2509_v14 = vld [vmem:[#allocation12 + $0xb4] sm:$0xf0]  ;;  %v2082_v23 = vld [vmem:[#allocation12 + $0xb8] sm:$0xf0]  ;;  %v2507_v30 = vld [vmem:[#allocation12 + $0xa4] sm:$0xf0] }
  0x83   :  { %476 = vmatpush.bf16.msra.mxu0 %v1943_v34  ;;  %v514_v62 = vmul.f32 %v2634_v51, %v513_v57  ;;  %v2085_v27 = vor.u32 %v2508_v20, %v2082_v23  ;;  %v2490_v33 = vld [vmem:[#allocation12 + $0x24] sm:$0xf]  ;;  %v498_v20 = vld [vmem:[#allocation10] sm:$0x3] }
  0x84   :  { %489 = vmatpush.bf16.msra.mxu1 %v1947_v35  ;;  %v2105_v35 = vor.u32 %v2515_v31, %v2104_v28 }
  0x85   :  { %v515_v3 = vadd.f32 %v2634_v51, %v514_v62  ;;  %v2088_v62 = vld [vmem:[#allocation12 + $0xc0] sm:$0xf] }
  0x86   :  { %800 = vmatpush.bf16.msra.mxu3 %v2105_v35 }
  0x87   :  { %477 = vmatpush.bf16.msra.mxu0 %v1935_v40  ;;  %v3413_v16 = vsel %vm516_vm0, %v2634_v51, %v515_v3  ;;  %v2109_v40 = vor.u32 %v2514_v37, %v2106_v38  ;;  %v2097_v51 = vor.u32 %v2513_v47, %v2096_v44  ;;  %v2026_v3 = vld [vmem:[#allocation12 + $0x48] sm:$0xf0]  ;;  %v2506_v37 = vld [vmem:[#allocation12 + $0xa4] sm:$0xf]  ;;  %v2489_v44 = vld [vmem:[#allocation12 + $0x14] sm:$0xf0] }
  0x88   :  { %490 = vmatpush.bf16.msra.mxu1 %v1939_v41  ;;  %v2074_v38 = vld [vmem:[#allocation12 + $0xa8] sm:$0xf0] }
  0x8a   :  { %801 = vmatpush.bf16.msra.mxu3 %v2097_v51  ;;  %v2504_v51 = vld [vmem:[#allocation12 + $0x94] sm:$0xf] }
  0x8b   :  { %478 = vmatpush.bf16.msra.mxu0 %v1927_v46  ;;  %v2033_v46 = vor.u32 %v2497_v43, %v2032_v42  ;;  %v2077_v43 = vor.u32 %v2506_v37, %v2074_v38 }
  0x8c   :  { %491 = vmatpush.bf16.msra.mxu1 %v1931_v48  ;;  %v2496_v48 = vld [vmem:[#allocation12 + $0x54] sm:$0xf] }
  0x8d   :  { %788 = vmatpush.bf16.msra.mxu2 %v2033_v46  ;;  %v2505_v46 = vld [vmem:[#allocation12 + $0x94] sm:$0xf0] }
  0x8e   :  { %479 = vmatmul.bf16.vlgmr.msra.gmra.mxu0 %v368_v49 }
  0x8f   :  { %492 = vmatmul.bf16.vlgmr.msra.gmra.mxu1 %v368_v49  ;;  %812 = vmatpush.bf16.msrb.mxu0 %v2053_v22  ;;  %v2034_v49 = vld [vmem:[#allocation12 + $0x58] sm:$0xf0]  ;;  %v2021_v22 = vor.u32 %v2492_v18, %v2018_v19 }
  0x90   :  { %825 = vmatpush.bf16.msrb.mxu1 %v2117_v25  ;;  %v2037_v52 = vor.u32 %v2496_v48, %v2034_v49  ;;  %v2491_v25 = vld [vmem:[#allocation12 + $0x24] sm:$0xf0]  ;;  %v2488_v49 = vld [vmem:[#allocation12 + $0x14] sm:$0xf] }
  0x93   :  { %813 = vmatpush.bf16.msrb.mxu0 %v2045_v36 }
  0x94   :  { %826 = vmatpush.bf16.msrb.mxu1 %v2109_v40  ;;  %v2000_v40 = vld [vmem:[#allocation12 + $0x10] sm:$0xf] }
  0x95   :  { %v2001_v48 = vor.u32 %v2489_v44, %v2000_v40 }
  0x97   :  { %814 = vmatpush.bf16.msrb.mxu0 %v2037_v52 }
 0x10b   :  { %v480_v56 = vpop.f32.mrf.mxu0 }
 0x10c   :  { %v481_v58 = vadd.f32 %v480_v56, %v387_v54  ;;  %v493_v59 = vpop.f32.mrf.mxu1  ;;  %v2098_v54 = vld [vmem:[#allocation12 + $0xd8] sm:$0xf0] }
 0x10d   :  { %v494_v60 = vadd.f32 %v493_v59, %v388_v55  ;;  %v2101_v56 = vor.u32 %v2512_v53, %v2098_v54  ;;  %v2495_v59 = vld [vmem:[#allocation12 + $0x44] sm:$0xf0]  ;;  %v2066_v54 = vld [vmem:[#allocation12 + $0x98] sm:$0xf0] }
 0x10e   :  { %v499_v61 = vrot.slane %v481_v58, 4 }
 0x10f   :  { %v505_v63 = vrot.slane %v494_v60, 4  ;;  %827 = vmatpush.bf16.msrb.mxu1 %v2101_v56  ;;  %v2487_v56 = vld [vmem:[#allocation12 + $0x4] sm:$0xf0] }
 0x110   :  { %v500_v0 = vadd.f32 %v499_v61, %v481_v58 }
 0x111   :  { %v506_v1 = vadd.f32 %v505_v63, %v494_v60  ;;  %v2511_v63 = vld [vmem:[#allocation12 + $0xc4] sm:$0xf0] }
 0x112   :  { %v501_v2 = vrot.slane %v500_v0, 2 }
 0x113   :  { %v507_v4 = vrot.slane %v506_v1, 2  ;;  %v482_v5 = vpop.f32.mrf.mxu0 }
 0x114   :  { %v502_v6 = vadd.f32 %v501_v2, %v500_v0  ;;  %v495_v7 = vpop.f32.mrf.mxu1  ;;  %v2494_v0 = vld [vmem:[#allocation12 + $0x44] sm:$0xf]  ;;  %v2089_v2 = vor.u32 %v2511_v63, %v2088_v62  ;;  %v2090_v5 = vld [vmem:[#allocation12 + $0xc8] sm:$0xf0]  ;;  %v2069_v62 = vor.u32 %v2504_v51, %v2066_v54 }
 0x115   :  { %v508_v8 = vadd.f32 %v507_v4, %v506_v1  ;;  %v2510_v4 = vld [vmem:[#allocation12 + $0xc4] sm:$0xf]  ;;  %v2029_v7 = vor.u32 %v2494_v0, %v2026_v3  ;;  %v1994_v0 = vld [vmem:[#allocation12 + $0x8] sm:$0xf0] }
 0x116   :  { %v503_v12 = vrot.slane %v502_v6, 1  ;;  %802 = vmatpush.bf16.msra.mxu3 %v2089_v2  ;;  %v2486_v63 = vld [vmem:[#allocation12 + $0x4] sm:$0xf]  ;;  %v2058_v3 = vld [vmem:[#allocation12 + $0x88] sm:$0xf0] }
 0x117   :  { %v509_v17 = vrot.slane %v508_v8, 1  ;;  %815 = vmatpush.bf16.msrb.mxu0 %v2029_v7  ;;  %v2502_v2 = vld [vmem:[#allocation12 + $0x84] sm:$0xf] }
 0x118   :  { %v504_v21 = vadd.f32 %v503_v12, %v502_v6  ;;  %v2017_v12 = vor.u32 %v2493_v10, %v2016_v9 }
 0x119   :  { %v510_v24 = vadd.f32 %v509_v17, %v508_v8  ;;  %v2093_v8 = vor.u32 %v2510_v4, %v2090_v5  ;;  %v2081_v17 = vor.u32 %v2509_v14, %v2080_v13  ;;  %v1997_v5 = vor.u32 %v2486_v63, %v1994_v0  ;;  %v2533_v0 = vld [vmem:[#allocation18 + $0x78] sm:$0xff] }
 0x11a   :  { %v518_v29 = vmul.f32 %v3413_v16, %v504_v21 }
 0x11b   :  { %v519_v34 = vmul.f32 %v3413_v16, %v510_v24  ;;  %828 = vmatpush.bf16.msrb.mxu1 %v2093_v8  ;;  %v2008_v24 = vld [vmem:[#allocation12 + $0x20] sm:$0xf]  ;;  %803 = vmatpush.bf16.msra.mxu3 %v2081_v17  ;;  %v497_v17 = vld [vmem:[#allocation9] sm:$0x3] }
 0x11c   :  { %v3417_v39 = vsub.f32 %v481_v58, %v518_v29  ;;  %v2024_v58 = vld [vmem:[#allocation12 + $0x40] sm:$0xf]  ;;  %v2009_v28 = vor.u32 %v2491_v25, %v2008_v24  ;;  %816 = vmatpush.bf16.msrb.mxu0 %v2021_v22  ;;  %v563_v22 = vperm.slane %v497_v17, 0  ;;  %v564_v24 = vperm.slane %v497_v17, 1  ;;  %v2524_v17 = vld [vmem:[#allocation18 + $0x30] sm:$0xff] }
 0x11d   :  { %v3419_v41 = vsub.f32 %v494_v60, %v519_v34  ;;  %v2025_v61 = vor.u32 %v2495_v59, %v2024_v58  ;;  %v2072_v29 = vld [vmem:[#allocation12 + $0xa0] sm:$0xf]  ;;  %v2010_v34 = vld [vmem:[#allocation12 + $0x28] sm:$0xf0] }
 0x11e   :  { %v522_v45 = vmul.f32 %v3417_v39, %v3417_v39  ;;  %v2073_v32 = vor.u32 %v2507_v30, %v2072_v29  ;;  %v2013_v36 = vor.u32 %v2490_v33, %v2010_v34  ;;  %v2056_v59 = vld [vmem:[#allocation12 + $0x80] sm:$0xf]  ;;  %v571_v29 = vperm.slane %v498_v20, 1 }
 0x11f   :  { %v523_v50 = vmul.f32 %v3419_v41, %v3419_v41  ;;  %789 = vmatpush.bf16.msra.mxu2 %v2025_v61  ;;  %829 = vmatpush.bf16.msrb.mxu1 %v2085_v27  ;;  %v570_v27 = vperm.slane %v498_v20, 0  ;;  %v2530_v20 = vld [vmem:[#allocation18 + $0x60] sm:$0xff] }
 0x120   :  { %v524_v55 = vrot.slane %v522_v45, 4  ;;  %804 = vmatpush.bf16.msra.mxu3 %v2073_v32  ;;  %817 = vmatpush.bf16.msrb.mxu0 %v2013_v36 }
 0x121   :  { %v530_v57 = vrot.slane %v523_v50, 4 }
 0x122   :  { %v525_v60 = vadd.f32 %v524_v55, %v522_v45  ;;  %v2064_v45 = vld [vmem:[#allocation12 + $0x90] sm:$0xf]  ;;  %v1992_v55 = vld [vmem:[#allocation12] sm:$0xf] }
 0x123   :  { %v531_v1 = vadd.f32 %v530_v57, %v523_v50  ;;  %790 = vmatpush.bf16.msra.mxu2 %v2017_v12  ;;  %v2002_v50 = vld [vmem:[#allocation12 + $0x18] sm:$0xf0]  ;;  %v2065_v53 = vor.u32 %v2505_v46, %v2064_v45  ;;  %830 = vmatpush.bf16.msrb.mxu1 %v2077_v43 }
 0x124   :  { %v526_v6 = vrot.slane %v525_v60, 2  ;;  %v2005_v58 = vor.u32 %v2488_v49, %v2002_v50 }
 0x125   :  { %v532_v11 = vrot.slane %v531_v1, 2  ;;  %805 = vmatpush.bf16.msra.mxu3 %v2065_v53 }
 0x126   :  { %v527_v15 = vadd.f32 %v526_v6, %v525_v60  ;;  %v2503_v60 = vld [vmem:[#allocation12 + $0x84] sm:$0xf0]  ;;  %818 = vmatpush.bf16.msrb.mxu0 %v2005_v58  ;;  %v2061_v6 = vor.u32 %v2502_v2, %v2058_v3 }
 0x127   :  { %v533_v21 = vadd.f32 %v532_v11, %v531_v1  ;;  %791 = vmatpush.bf16.msra.mxu2 %v2009_v28  ;;  %v1993_v1 = vor.u32 %v2487_v56, %v1992_v55  ;;  %v2057_v4 = vor.u32 %v2503_v60, %v2056_v59  ;;  %831 = vmatpush.bf16.msrb.mxu1 %v2069_v62 }
 0x128   :  { %v528_v26 = vrot.slane %v527_v15, 1 }
 0x129   :  { %v534_v31 = vrot.slane %v533_v21, 1  ;;  %806 = vmatpush.bf16.msra.mxu3 %v2057_v4 }
 0x12a   :  { %v529_v35 = vadd.f32 %v528_v26, %v527_v15  ;;  %819 = vmatpush.bf16.msrb.mxu0 %v1997_v5 }
 0x12b   :  { %v535_v42 = vadd.f32 %v534_v31, %v533_v21  ;;  %792 = vmatpush.bf16.msra.mxu2 %v2001_v48  ;;  %832 = vmatpush.bf16.msrb.mxu1 %v2061_v6 }
 0x12c   :  { %v536_v47 = vmul.f32 %v529_v35, %v3413_v16 }
 0x12d   :  { %v537_v52 = vmul.f32 %v535_v42, %v3413_v16  ;;  %1067 = vmatpush.bf16.msrb.mxu3 %v2533_v0 }
 0x12e   :  { %v538_v57 = vadd.f32 1e-05, %v536_v47 }
 0x12f   :  { %v539_v61 = vadd.f32 1e-05, %v537_v52  ;;  %793 = vmatpush.bf16.msra.mxu2 %v1993_v1 }
 0x130   :  { %2635 = vrsqrt.f32 %v538_v57  ;;  %vm546_vm3 = vweird.f32 %v538_v57 }
 0x131   :  { %2637 = vrsqrt.f32 %v539_v61  ;;  %vm556_vm5 = vweird.f32 %v539_v61 }
 0x136   :  { %v2636_v7 = vpop.eup %2635 }
 0x137   :  { %v2638_v8 = vpop.eup %2637  ;;  %v541_v9 = vmul.f32 %v2636_v7, %v538_v57  ;;  %vm547_vm1 = vweird.f32 %v2636_v7 }
 0x138   :  { %v551_v10 = vmul.f32 %v2638_v8, %v539_v61  ;;  %vm557_vm2 = vweird.f32 %v2638_v8  ;;  %vm548_vm4 = vmor %vm546_vm3, %vm547_vm1  ;;  %vm1123_vm1 = vcmask 523264  }
 0x139   :  { %v542_v11 = vmul.f32 %v2636_v7, %v541_v9  ;;  %vm558_vm6 = vmor %vm556_vm5, %vm557_vm2 }
 0x13a   :  { %v552_v12 = vmul.f32 %v2638_v8, %v551_v10  ;;  %v2525_v10 = vld [vmem:[#allocation18 + $0x38] sm:$0xff] }
 0x13b   :  { %v543_v13 = vmul.f32 0.5, %v542_v11  ;;  %1054 = vmatpush.bf16.msrb.mxu2 %v2525_v10 }
 0x13c   :  { %v553_v14 = vmul.f32 0.5, %v552_v12 }
 0x13d   :  { %v544_v15 = vsub.f32 1.5, %v543_v13  ;;  %v2531_v13 = vld [vmem:[#allocation18 + $0x68] sm:$0xff] }
 0x13e   :  { %v554_v18 = vsub.f32 1.5, %v553_v14 }
 0x13f   :  { %v545_v19 = vmul.f32 %v2636_v7, %v544_v15  ;;  %1055 = vmatpush.bf16.msrb.mxu2 %v2524_v17 }
 0x140   :  { %v555_v21 = vmul.f32 %v2638_v8, %v554_v18 }
 0x141   :  { %v549_v23 = vsel %vm548_vm4, %v2636_v7, %v545_v19  ;;  %v2532_v7 = vld [vmem:[#allocation18 + $0x70] sm:$0xff] }
 0x142   :  { %v560_v25 = vmul.f32 %v549_v23, %v3417_v39  ;;  %v559_v26 = vsel %vm558_vm6, %v2638_v8, %v555_v21  ;;  %1068 = vmatpush.bf16.msrb.mxu3 %v2532_v7  ;;  %v2523_v23 = vld [vmem:[#allocation18 + $0x28] sm:$0xff] }
 0x143   :  { %v561_v28 = vmul.f32 %v559_v26, %v3419_v41  ;;  %v620_v41 = vld [vmem:[#allocation13] sm:$0x3]  ;;  %1056 = vmatpush.bf16.msrb.mxu2 %v2523_v23 }
 0x144   :  { %v567_v30 = vmul.f32 %v563_v22, %v560_v25  ;;  %v623_v45 = vperm.slane %v620_v41, 1  ;;  %v622_v50 = vperm.slane %v620_v41, 0  ;;  %v2529_v26 = vld [vmem:[#allocation18 + $0x58] sm:$0xff] }
 0x145   :  { %v568_v31 = vmul.f32 %v564_v24, %v561_v28 }
 0x146   :  { %v574_v32 = vadd.f32 %v570_v27, %v567_v30  ;;  %1069 = vmatpush.bf16.msrb.mxu3 %v2531_v13 }
 0x147   :  { %v575_v33 = vadd.f32 %v571_v29, %v568_v31  ;;  %v2522_v29 = vld [vmem:[#allocation18 + $0x20] sm:$0xff] }
 0x148   :  { %v578_v34 = vmul.f32 1.442695, %v574_v32  ;;  %vm576_vm7 = vcmp.gt.f32.partialorder %v574_v32, 0.0  ;;  %1057 = vmatpush.bf16.msrb.mxu2 %v2522_v29  ;;  %v2537_v29 = vld [vmem:[%s3531_s13 + $0x18] sm:$0xff] }
 0x149   :  { %v580_v35 = vmul.f32 1.442695, %v575_v33  ;;  %vm577_vm8 = vcmp.gt.f32.partialorder %v575_v33, 0.0  ;;  %1131 = vmatpush.bf16.msra.mxu0 %v2537_v29 }
 0x14a   :  { %2639 = vpow2.f32 %v578_v34  ;;  %1070 = vmatpush.bf16.msrb.mxu3 %v2530_v20  ;;  %v2630_v20 = vld [vmem:[#allocation19] ss:$0 sm:$0xff] }
 0x14b   :  { %2641 = vpow2.f32 %v580_v35 }
 0x14e   :  { %1071 = vmatpush.bf16.msrb.mxu3 %v2529_v26 }
 0x150   :  { %v2640_v36 = vpop.eup %2639 }
 0x151   :  { %v2642_v37 = vpop.eup %2641  ;;  %v1988_v38 = vadd.f32 -1.0, %v2640_v36  ;;  %v2527_v36 = vld [vmem:[#allocation18 + $0x48] sm:$0xff] }
 0x152   :  { %v1989_v40 = vadd.f32 -1.0, %v2642_v37 }
 0x153   :  { %v584_v42 = vsel %vm576_vm7, %v574_v32, %v1988_v38  ;;  %v2528_v32 = vld [vmem:[#allocation18 + $0x50] sm:$0xff] }
 0x154   :  { %v586_v39 = vpack.c.bf16 %v584_v42, %v584_v42  ;;  %v585_v43 = vsel %vm577_vm8, %v575_v33, %v1989_v40  ;;  %v2521_v33 = vld [vmem:[#allocation18 + $0x18] sm:$0xff]  ;;  %1072 = vmatpush.bf16.msrb.mxu3 %v2528_v32  ;;  %v2520_v40 = vld [vmem:[#allocation18 + $0x10] sm:$0xff]  ;;  %v2534_v32 = vld [vmem:[%s3531_s13] sm:$0xff] }
 0x155   :  { %v587_v44 = vpack.c.bf16 %v585_v43, %v585_v43  ;;  %1058 = vmatpush.bf16.msrb.mxu2 %v2521_v33  ;;  %v2259_v33 = vld [vmem:[#allocation21 + $0x70] sm:$0xf] }
 0x156   :  { %794 = vmatmul.bf16.vlgmr.msra.gmra.mxu2 %v586_v39  ;;  %820 = vmatmul.bf16.vlgmr.msrb.gmra.mxu0 %v586_v39  ;;  %v2526_v39 = vld [vmem:[#allocation18 + $0x40] sm:$0xff] }
 0x157   :  { %807 = vmatmul.bf16.vlgmr.msra.gmra.mxu3 %v587_v44  ;;  %833 = vmatmul.bf16.vlgmr.msrb.gmra.mxu1 %v587_v44  ;;  %v2519_v44 = vld [vmem:[#allocation18 + $0x8] sm:$0xff] }
 0x158   :  { %1073 = vmatpush.bf16.msrb.mxu3 %v2527_v36 }
 0x159   :  { %1059 = vmatpush.bf16.msrb.mxu2 %v2520_v40  ;;  %v2551_v40 = vld [vmem:[#allocation21 + $0x64] sm:$0xf0] }
 0x15c   :  { %1074 = vmatpush.bf16.msrb.mxu3 %v2526_v39  ;;  %v2550_v39 = vld [vmem:[#allocation21 + $0x64] sm:$0xf] }
 0x15d   :  { %1060 = vmatpush.bf16.msrb.mxu2 %v2519_v44 }
 0x1d3   :  { %v821_v46 = vpop.f32.mrf.mxu0 }
 0x1d4   :  { %v822_v47 = vadd.f32 %v821_v46, %v623_v45  ;;  %v834_v48 = vpop.f32.mrf.mxu1  ;;  %v2518_v46 = vld [vmem:[#allocation18] sm:$0xff] }
 0x1d5   :  { %1061 = vmatpush.bf16.msrb.mxu2 %v2518_v46  ;;  %v2549_v46 = vld [vmem:[#allocation21 + $0x54] sm:$0xf0] }
 0x1d6   :  { %v835_v49 = vadd.f32 %v834_v48, %v822_v47 }
 0x1d8   :  { %v846_v51 = vrot.slane %v835_v49, 4 }
 0x1d9   :  { %v795_v52 = vpop.f32.mrf.mxu2 }
 0x1da   :  { %v847_v53 = vadd.f32 %v846_v51, %v835_v49  ;;  %v796_v54 = vadd.f32 %v795_v52, %v622_v50  ;;  %v808_v55 = vpop.f32.mrf.mxu3  ;;  %v838_v51 = vld [vmem:[#allocation15] sm:$0x3] }
 0x1db   :  { %v823_v56 = vpop.f32.mrf.mxu0 }
 0x1dc   :  { %v848_v57 = vrot.slane %v847_v53, 2  ;;  %v809_v58 = vadd.f32 %v808_v55, %v796_v54  ;;  %v836_v59 = vpop.f32.mrf.mxu1  ;;  %v839_v56 = vld [vmem:[#allocation16] sm:$0x3] }
 0x1de   :  { %v849_v60 = vadd.f32 %v848_v57, %v847_v53  ;;  %v840_v61 = vrot.slane %v809_v58, 4  ;;  %v898_v57 = vperm.slane %v838_v51, 1 }
 0x1e0   :  { %v850_v62 = vrot.slane %v849_v60, 1  ;;  %v841_v63 = vadd.f32 %v840_v61, %v809_v58  ;;  %v905_v61 = vperm.slane %v839_v56, 1 }
 0x1e1   :  { %v797_v1 = vpop.f32.mrf.mxu2 }
 0x1e2   :  { %v851_v2 = vadd.f32 %v850_v62, %v849_v60  ;;  %v842_v3 = vrot.slane %v841_v63, 2  ;;  %v810_v4 = vpop.f32.mrf.mxu3  ;;  %v897_v1 = vperm.slane %v838_v51, 0  ;;  %v2235_v51 = vld [vmem:[#allocation21 + $0x40] sm:$0xf] }
 0x1e4   :  { %v853_v5 = vmul.f32 %v851_v2, %v3413_v16  ;;  %v843_v6 = vadd.f32 %v842_v3, %v841_v63 }
 0x1e6   :  { %v3430_v8 = vsub.f32 %v835_v49, %v853_v5  ;;  %v844_v9 = vrot.slane %v843_v6, 1 }
 0x1e8   :  { %v857_v11 = vmul.f32 %v3430_v8, %v3430_v8  ;;  %v845_v12 = vadd.f32 %v844_v9, %v843_v6  ;;  %v904_v6 = vperm.slane %v839_v56, 0 }
 0x1ea   :  { %v864_v14 = vrot.slane %v857_v11, 4  ;;  %v852_v15 = vmul.f32 %v845_v12, %v3413_v16 }
 0x1ec   :  { %v865_v18 = vadd.f32 %v864_v14, %v857_v11  ;;  %v3435_v19 = vsub.f32 %v809_v58, %v852_v15 }
 0x1ee   :  { %v866_v21 = vrot.slane %v865_v18, 2  ;;  %v856_v22 = vmul.f32 %v3435_v19, %v3435_v19 }
 0x1f0   :  { %v867_v24 = vadd.f32 %v866_v21, %v865_v18  ;;  %v858_v25 = vrot.slane %v856_v22, 4 }
 0x1f2   :  { %v868_v27 = vrot.slane %v867_v24, 1  ;;  %v859_v28 = vadd.f32 %v858_v25, %v856_v22 }
 0x1f4   :  { %v869_v30 = vadd.f32 %v868_v27, %v867_v24  ;;  %v860_v31 = vrot.slane %v859_v28, 2 }
 0x1f6   :  { %v871_v34 = vmul.f32 %v869_v30, %v3413_v16  ;;  %v861_v35 = vadd.f32 %v860_v31, %v859_v28  ;;  %v2536_v30 = vld [vmem:[%s3531_s13 + $0x10] sm:$0xff]  ;;  %v2535_v31 = vld [vmem:[%s3531_s13 + $0x8] sm:$0xff]  ;;  %s3196_s13 = smov 32  }
 0x1f7   :  { %1132 = vmatpush.bf16.msra.mxu0 %v2536_v30  ;;  %v1157_v30 = vld [vmem:[#allocation22] sm:$0x3] }
 0x1f8   :  { %v873_v37 = vadd.f32 1e-05, %v871_v34  ;;  %v862_v38 = vrot.slane %v861_v35, 1  ;;  %v2553_v34 = vld [vmem:[#allocation21 + $0x74] sm:$0xf0] }
 0x1f9   :  { %v2260_v36 = vor.u32 %v2553_v34, %v2259_v33 }
 0x1fa   :  { %2643 = vrsqrt.f32 %v873_v37  ;;  %v863_v42 = vadd.f32 %v862_v38, %v861_v35  ;;  %vm890_vm10 = vweird.f32 %v873_v37  ;;  %v2552_v35 = vld [vmem:[#allocation21 + $0x74] sm:$0xf]  ;;  %v2251_v38 = vld [vmem:[#allocation21 + $0x60] sm:$0xf] }
 0x1fb   :  { %1133 = vmatpush.bf16.msra.mxu0 %v2535_v31  ;;  %1243 = vmatpush.bf16.msra.mxu1 %v2260_v36  ;;  %v2252_v44 = vor.u32 %v2551_v40, %v2251_v38  ;;  %v1159_v31 = vperm.slane %v1157_v30, 0 }
 0x1fc   :  { %v870_v43 = vmul.f32 %v863_v42, %v3413_v16 }
 0x1fe   :  { %v872_v41 = vadd.f32 1e-05, %v870_v43  ;;  %v2253_v43 = vld [vmem:[#allocation21 + $0x68] sm:$0xf0] }
 0x1ff   :  { %1134 = vmatpush.bf16.msra.mxu0 %v2534_v32  ;;  %1244 = vmatpush.bf16.msra.mxu1 %v2252_v44  ;;  %v2325_v44 = vld [vmem:[#allocation27 + $0x70] sm:$0xf] }
 0x200   :  { %v2644_v45 = vpop.eup %2643  ;;  %2645 = vrsqrt.f32 %v872_v41  ;;  %vm880_vm13 = vweird.f32 %v872_v41 }
 0x201   :  { %v885_v47 = vmul.f32 %v2644_v45, %v873_v37  ;;  %vm891_vm9 = vweird.f32 %v2644_v45  ;;  %v2261_v37 = vld [vmem:[#allocation21 + $0x78] sm:$0xf0] }
 0x202   :  { %vm892_vm11 = vmor %vm890_vm10, %vm891_vm9  ;;  %v2264_v42 = vor.u32 %v2552_v35, %v2261_v37  ;;  %v1160_v35 = vperm.slane %v1157_v30, 1  ;;  %v2303_v30 = vld [vmem:[#allocation27 + $0x48] sm:$0xf0]  ;;  %vm1868_vm10 = vcmask 261120  }
 0x203   :  { %v886_v48 = vmul.f32 %v2644_v45, %v885_v47  ;;  %v2548_v47 = vld [vmem:[#allocation21 + $0x54] sm:$0xf] }
 0x204   :  { %1256 = vmatpush.bf16.msra.mxu2 %v2264_v42 }
 0x205   :  { %v887_v49 = vmul.f32 0.5, %v886_v48  ;;  %v2245_v48 = vld [vmem:[#allocation21 + $0x58] sm:$0xf0] }
 0x206   :  { %v2646_v50 = vpop.eup %2645 }
 0x207   :  { %v888_v52 = vsub.f32 1.5, %v887_v49  ;;  %v875_v53 = vmul.f32 %v2646_v50, %v872_v41  ;;  %vm881_vm12 = vweird.f32 %v2646_v50  ;;  %v2256_v41 = vor.u32 %v2550_v39, %v2253_v43 }
 0x208   :  { %vm882_vm14 = vmor %vm880_vm13, %vm881_vm12 }
 0x209   :  { %v889_v54 = vmul.f32 %v2644_v45, %v888_v52  ;;  %v876_v55 = vmul.f32 %v2646_v50, %v875_v53  ;;  %1257 = vmatpush.bf16.msra.mxu2 %v2256_v41  ;;  %v2547_v52 = vld [vmem:[#allocation21 + $0x44] sm:$0xf0]  ;;  %v2546_v53 = vld [vmem:[#allocation21 + $0x44] sm:$0xf]  ;;  %v2569_v41 = vld [vmem:[#allocation27 + $0x74] sm:$0xf0] }
 0x20b   :  { %v893_v58 = vsel %vm892_vm11, %v2644_v45, %v889_v54  ;;  %v877_v59 = vmul.f32 0.5, %v876_v55  ;;  %v2243_v45 = vld [vmem:[#allocation21 + $0x50] sm:$0xf]  ;;  %v2237_v54 = vld [vmem:[#allocation21 + $0x48] sm:$0xf0]  ;;  %v2236_v55 = vor.u32 %v2547_v52, %v2235_v51 }
 0x20c   :  { %v895_v60 = vmul.f32 %v893_v58, %v3430_v8  ;;  %v2244_v49 = vor.u32 %v2549_v46, %v2243_v45  ;;  %v2240_v56 = vor.u32 %v2546_v53, %v2237_v54  ;;  %v2568_v45 = vld [vmem:[#allocation27 + $0x74] sm:$0xf]  ;;  %v2317_v54 = vld [vmem:[#allocation27 + $0x60] sm:$0xf] }
 0x20d   :  { %v878_v62 = vsub.f32 1.5, %v877_v59 }
 0x20e   :  { %v902_v63 = vmul.f32 %v898_v57, %v895_v60  ;;  %1245 = vmatpush.bf16.msra.mxu1 %v2244_v49  ;;  %v1080_v57 = vld [vmem:[#allocation2] sm:$0xff] }
 0x20f   :  { %v879_v0 = vmul.f32 %v2646_v50, %v878_v62  ;;  %v2327_v49 = vld [vmem:[#allocation27 + $0x78] sm:$0xf0] }
 0x210   :  { %v909_v2 = vadd.f32 %v905_v61, %v902_v63 }
 0x211   :  { %v883_v3 = vsel %vm882_vm14, %v2646_v50, %v879_v0  ;;  %v2248_v50 = vor.u32 %v2548_v47, %v2245_v48  ;;  %v2227_v0 = vld [vmem:[#allocation21 + $0x30] sm:$0xf]  ;;  %v2326_v48 = vor.u32 %v2569_v41, %v2325_v44 }
 0x212   :  { %v894_v4 = vmul.f32 %v883_v3, %v3435_v19  ;;  %v914_v5 = vmul.f32 1.442695, %v909_v2  ;;  %vm911_vm15 = vcmp.gt.f32.partialorder %v909_v2, 0.0  ;;  %1246 = vmatpush.bf16.msra.mxu1 %v2236_v55  ;;  %v2567_v55 = vld [vmem:[#allocation27 + $0x64] sm:$0xf0] }
 0x213   :  { %1258 = vmatpush.bf16.msra.mxu2 %v2248_v50  ;;  %v2330_v50 = vor.u32 %v2568_v45, %v2327_v49  ;;  %1551 = vmatpush.bf16.msra.mxu3 %v2326_v48  ;;  %v2365_v48 = vld [vmem:[#allocation27 + $0xc0] sm:$0xf]  ;;  %v2579_v49 = vld [vmem:[#allocation27 + $0xc4] sm:$0xf0] }
 0x214   :  { %v901_v7 = vmul.f32 %v897_v1, %v894_v4  ;;  %2647 = vpow2.f32 %v914_v5  ;;  %v2545_v1 = vld [vmem:[#allocation21 + $0x34] sm:$0xf0]  ;;  %v2229_v4 = vld [vmem:[#allocation21 + $0x38] sm:$0xf0] }
 0x215   :  { %v2228_v3 = vor.u32 %v2545_v1, %v2227_v0  ;;  %v2585_v0 = vld [vmem:[#allocation27 + $0xf4] sm:$0xf0]  ;;  %v2584_v1 = vld [vmem:[#allocation27 + $0xf4] sm:$0xf] }
 0x216   :  { %v908_v9 = vadd.f32 %v904_v6, %v901_v7  ;;  %v2219_v6 = vld [vmem:[#allocation21 + $0x20] sm:$0xf]  ;;  %v2543_v7 = vld [vmem:[#allocation21 + $0x24] sm:$0xf0] }
 0x217   :  { %1259 = vmatpush.bf16.msra.mxu2 %v2240_v56  ;;  %1247 = vmatpush.bf16.msra.mxu1 %v2228_v3  ;;  %v2566_v56 = vld [vmem:[#allocation27 + $0x64] sm:$0xf] }
 0x218   :  { %v912_v10 = vmul.f32 1.442695, %v908_v9  ;;  %vm910_vm0 = vcmp.gt.f32.partialorder %v908_v9, 0.0 }
 0x21a   :  { %v2648_v11 = vpop.eup %2647  ;;  %2649 = vpow2.f32 %v912_v10  ;;  %v2220_v10 = vor.u32 %v2543_v7, %v2219_v6  ;;  %v2309_v7 = vld [vmem:[#allocation27 + $0x50] sm:$0xf] }
 0x21b   :  { %v2119_v8 = vadd.f32 -1.0, %v2648_v11  ;;  %v2221_v11 = vld [vmem:[#allocation21 + $0x28] sm:$0xf0] }
 0x21c   :  { %1248 = vmatpush.bf16.msra.mxu1 %v2220_v10  ;;  %v2564_v10 = vld [vmem:[#allocation27 + $0x54] sm:$0xf] }
 0x21d   :  { %v919_v12 = vsel %vm911_vm15, %v909_v2, %v2119_v8  ;;  %v2544_v2 = vld [vmem:[#allocation21 + $0x34] sm:$0xf]  ;;  %v2211_v8 = vld [vmem:[#allocation21 + $0x10] sm:$0xf] }
 0x21e   :  { %v921_v13 = vpack.c.bf16 %v919_v12, %v919_v12  ;;  %v2232_v5 = vor.u32 %v2544_v2, %v2229_v4  ;;  %v2541_v12 = vld [vmem:[#allocation21 + $0x14] sm:$0xf0] }
 0x220   :  { %v2650_v14 = vpop.eup %2649  ;;  %1075 = vmatmul.bf16.vlgmr.msrb.gmra.mxu3 %v921_v13  ;;  %1260 = vmatpush.bf16.msra.mxu2 %v2232_v5  ;;  %v2391_v5 = vld [vmem:[#allocation27 + $0xf8] sm:$0xf0] }
 0x221   :  { %v2118_v15 = vadd.f32 -1.0, %v2650_v14  ;;  %v2540_v14 = vld [vmem:[#allocation21 + $0x14] sm:$0xf]  ;;  %v2394_v6 = vor.u32 %v2584_v1, %v2391_v5 }
 0x222   :  { %v2357_v1 = vld [vmem:[#allocation27 + $0xb0] sm:$0xf] }
 0x223   :  { %v918_v17 = vsel %vm910_vm0, %v908_v9, %v2118_v15  ;;  %v2542_v9 = vld [vmem:[#allocation21 + $0x24] sm:$0xf]  ;;  %v2213_v15 = vld [vmem:[#allocation21 + $0x18] sm:$0xf0] }
 0x224   :  { %v920_v18 = vpack.c.bf16 %v918_v17, %v918_v17  ;;  %v2224_v13 = vor.u32 %v2542_v9, %v2221_v11  ;;  %v2212_v17 = vor.u32 %v2541_v12, %v2211_v8  ;;  %v2565_v9 = vld [vmem:[#allocation27 + $0x54] sm:$0xf0] }
 0x225   :  { %v2310_v12 = vor.u32 %v2565_v9, %v2309_v7  ;;  %v2359_v9 = vld [vmem:[#allocation27 + $0xb8] sm:$0xf0] }
 0x226   :  { %1062 = vmatmul.bf16.vlgmr.msrb.gmra.mxu2 %v920_v18  ;;  %v2216_v18 = vor.u32 %v2540_v14, %v2213_v15  ;;  %1249 = vmatpush.bf16.msra.mxu1 %v2212_v17  ;;  %v2381_v15 = vld [vmem:[#allocation27 + $0xe0] sm:$0xf]  ;;  %v2583_v17 = vld [vmem:[#allocation27 + $0xe4] sm:$0xf0] }
 0x227   :  { %1261 = vmatpush.bf16.msra.mxu2 %v2224_v13  ;;  %v2311_v13 = vld [vmem:[#allocation27 + $0x58] sm:$0xf0] }
 0x228   :  { %v2314_v14 = vor.u32 %v2564_v10, %v2311_v13  ;;  %v2277_v10 = vld [vmem:[#allocation27 + $0x10] sm:$0xf]  ;;  %v2556_v13 = vld [vmem:[#allocation27 + $0x14] sm:$0xf] }
 0x22b   :  { %1262 = vmatpush.bf16.msra.mxu2 %v2216_v18  ;;  %v2582_v18 = vld [vmem:[#allocation27 + $0xe4] sm:$0xf] }
 0x2a3   :  { %v1076_v19 = vpop.f32.mrf.mxu3 }
 0x2a9   :  { %v1063_v21 = vpop.f32.mrf.mxu2 }
 0x2aa   :  { %v1064_v22 = vadd.f32 %v2630_v20, %v1063_v21  ;;  %v2539_v20 = vld [vmem:[#allocation21 + $0x4] sm:$0xf0]  ;;  %v2538_v21 = vld [vmem:[#allocation21 + $0x4] sm:$0xf] }
 0x2ab   :  { %v1078_v23 = vpop.f32.mrf.mxu3 }
 0x2ac   :  { %v1077_v24 = vadd.f32 %v1076_v19, %v1064_v22  ;;  %v2203_v19 = vld [vmem:[#allocation21] sm:$0xf]  ;;  %v2205_v23 = vld [vmem:[#allocation21 + $0x8] sm:$0xf0] }
 0x2ad   :  { %v2204_v22 = vor.u32 %v2539_v20, %v2203_v19 }
 0x2ae   :  { %1891 = vrot.lane.b32.xlu1 %v1077_v24, %s3188_s15  ;;  %v1081_v25 = vmul.f32 0.5, %v1077_v24 }
 0x2af   :  { %1250 = vmatpush.bf16.msra.mxu1 %v2204_v22  ;;  %v2383_v22 = vld [vmem:[#allocation27 + $0xe8] sm:$0xf0] }
 0x2b0   :  { %v1082_v26 = vmul.f32 1.442695, %v1081_v25 }
 0x2b1   :  { %v1065_v27 = vpop.f32.mrf.mxu2 }
 0x2b2   :  { %2651 = vpow2.f32 %v1082_v26 }
 0x2b3   :  { %1577 = vmatpush.bf16.msrb.mxu1 %v2330_v50  ;;  %v2578_v50 = vld [vmem:[#allocation27 + $0xc4] sm:$0xf] }
 0x2b8   :  { %v2652_v28 = vpop.eup %2651 }
 0x2b9   :  { %1085 = vrot.lane.b32.xlu0 %v2652_v28, %s3188_s15 }
 0x320   :  { %v3457_v61 = vpop.permute.xlu1 %1891 }
 0x32b   :  { %v1086_v58 = vpop.permute.xlu0 %1085 }
 0x32c   :  { %v1088_v59 = vmul.f32 %v1086_v58, %v1080_v57 }
 0x32e   :  { %v1089_v60 = vadd.f32 %v1088_v59, %v1077_v24  ;;  %v2208_v24 = vor.u32 %v2538_v21, %v2205_v23  ;;  %v2318_v59 = vor.u32 %v2567_v55, %v2317_v54  ;;  %v2382_v21 = vor.u32 %v2583_v17, %v2381_v15  ;;  %v2367_v54 = vld [vmem:[#allocation27 + $0xc8] sm:$0xf0]  ;;  %v2349_v15 = vld [vmem:[#allocation27 + $0xa0] sm:$0xf] }
 0x32f   :  { %v2386_v23 = vor.u32 %v2582_v18, %v2383_v22  ;;  %v2370_v55 = vor.u32 %v2578_v50, %v2367_v54  ;;  %v2574_v22 = vld [vmem:[#allocation27 + $0xa4] sm:$0xf] }
 0x330   :  { %v1090_v62 = vpack.c.bf16 %v1089_v60, %v1089_v60  ;;  %1886 = vrot.lane.b32.xlu0 %v1089_v60, %s3196_s13  ;;  %v1894_v63 = vsel %vm1123_vm1, %v1089_v60, %v3457_v61  ;;  %1263 = vmatpush.bf16.msra.mxu2 %v2208_v24  ;;  %v2301_v24 = vld [vmem:[#allocation27 + $0x40] sm:$0xf] }
 0x331   :  { %1895 = vst [vmem:[%s3544_s26] sm:$0xff] %v1894_v63  ;;  %v2389_v63 = vld [vmem:[#allocation27 + $0xf0] sm:$0xf]  ;;  %1552 = vmatpush.bf16.msra.mxu3 %v2318_v59 }
 0x332   :  { %2200 = vmatmul.msk.bf16.vlgmr.msra.gmra.mxu0 %vm1123_vm1, %v1090_v62  ;;  %v2390_v4 = vor.u32 %v2585_v0, %v2389_v63  ;;  %v2287_v63 = vld [vmem:[#allocation27 + $0x28] sm:$0xf0] }
 0x334   :  { %1564 = vmatpush.bf16.msrb.mxu0 %v2390_v4  ;;  %1590 = vmatpush.bf16.msrb.mxu2 %v2394_v6  ;;  %v2576_v4 = vld [vmem:[#allocation27 + $0xb4] sm:$0xf] }
 0x335   :  { %1553 = vmatpush.bf16.msra.mxu3 %v2310_v12 }
 0x338   :  { %1565 = vmatpush.bf16.msrb.mxu0 %v2382_v21  ;;  %1591 = vmatpush.bf16.msrb.mxu2 %v2386_v23  ;;  %v2351_v23 = vld [vmem:[#allocation27 + $0xa8] sm:$0xf0] }
 0x3a2   :  { %v1887_v25 = vpop.permute.xlu0 %1886 }
 0x3a3   :  { %v1889_v26 = vsub.f32 %v1089_v60, %v1887_v25  ;;  %v2319_v60 = vld [vmem:[#allocation27 + $0x68] sm:$0xf0]  ;;  %v2563_v25 = vld [vmem:[#allocation27 + $0x44] sm:$0xf0] }
 0x3a4   :  { %v2322_v62 = vor.u32 %v2566_v56, %v2319_v60  ;;  %v2285_v56 = vld [vmem:[#allocation27 + $0x20] sm:$0xf] }
 0x3a5   :  { %1901 = vrot.lane.b32.xlu2 %v1889_v26, %s3188_s15  ;;  %v2562_v26 = vld [vmem:[#allocation27 + $0x44] sm:$0xf] }
 0x3a6   :  { %1578 = vmatpush.bf16.msrb.mxu1 %v2322_v62 }
 0x3aa   :  { %1579 = vmatpush.bf16.msrb.mxu1 %v2314_v14  ;;  %v2279_v14 = vld [vmem:[#allocation27 + $0x18] sm:$0xf0] }
 0x3af   :  { %v1136_v27 = vpop.f32.mrf.mxu0 }
 0x3b0   :  { %v1140_v28 = vpack.c.bf16 %v1136_v27, %v1136_v27 }
 0x3b2   :  { %1251 = vmatmul.bf16.vlgmr.msra.gmra.mxu1 %v1140_v28  ;;  %1264 = vmatmul.bf16.vlgmr.msra.gmra.mxu2 %v1140_v28 }
 0x3b7   :  { %v1138_v29 = vpop.f32.mrf.mxu0 }
 0x3b8   :  { %v2302_v29 = vor.u32 %v2563_v25, %v2301_v24  ;;  %v2269_v24 = vld [vmem:[#allocation27] sm:$0xf] }
 0x3ba   :  { %1554 = vmatpush.bf16.msra.mxu3 %v2302_v29  ;;  %v2554_v29 = vld [vmem:[#allocation27 + $0x4] sm:$0xf] }
 0x42f   :  { %v1252_v32 = vpop.f32.mrf.mxu1 }
 0x430   :  { %v1253_v33 = vadd.f32 %v1252_v32, %v1159_v31  ;;  %v2306_v31 = vor.u32 %v2562_v26, %v2303_v30  ;;  %v2373_v32 = vld [vmem:[#allocation27 + $0xd0] sm:$0xf]  ;;  %v2354_v26 = vor.u32 %v2574_v22, %v2351_v23  ;;  %v2271_v30 = vld [vmem:[#allocation27 + $0x8] sm:$0xf0] }
 0x432   :  { %v1271_v34 = vrot.slane %v1253_v33, 4  ;;  %1580 = vmatpush.bf16.msrb.mxu1 %v2306_v31 }
 0x434   :  { %v1272_v36 = vadd.f32 %v1271_v34, %v1253_v33  ;;  %v2580_v34 = vld [vmem:[#allocation27 + $0xd4] sm:$0xf] }
 0x435   :  { %v1265_v37 = vpop.f32.mrf.mxu2 }
 0x436   :  { %v1273_v38 = vrot.slane %v1272_v36, 2  ;;  %v1266_v40 = vadd.f32 %v1265_v37, %v1160_v35 }
 0x437   :  { %v1254_v42 = vpop.f32.mrf.mxu1 }
 0x438   :  { %v1274_v39 = vadd.f32 %v1273_v38, %v1272_v36  ;;  %v1277_v43 = vrot.slane %v1266_v40, 4  ;;  %v2375_v38 = vld [vmem:[#allocation27 + $0xd8] sm:$0xf0] }
 0x439   :  { %v2378_v42 = vor.u32 %v2580_v34, %v2375_v38  ;;  %v2573_v34 = vld [vmem:[#allocation27 + $0x94] sm:$0xf0]  ;;  %v2343_v38 = vld [vmem:[#allocation27 + $0x98] sm:$0xf0] }
 0x43a   :  { %v1275_v46 = vrot.slane %v1274_v39, 1  ;;  %v1278_v47 = vadd.f32 %v1277_v43, %v1266_v40  ;;  %v2560_v43 = vld [vmem:[#allocation27 + $0x34] sm:$0xf] }
 0x43b   :  { %1592 = vmatpush.bf16.msrb.mxu2 %v2378_v42 }
 0x43c   :  { %v1276_v51 = vadd.f32 %v1275_v46, %v1274_v39  ;;  %v1279_v52 = vrot.slane %v1278_v47, 2  ;;  %v2293_v39 = vld [vmem:[#allocation27 + $0x30] sm:$0xf]  ;;  %v2295_v46 = vld [vmem:[#allocation27 + $0x38] sm:$0xf0] }
 0x43d   :  { %v1267_v53 = vpop.f32.mrf.mxu2 }
 0x43e   :  { %v1283_v57 = vmul.f32 %v1276_v51, %v3413_v16  ;;  %v1280_v58 = vadd.f32 %v1279_v52, %v1278_v47  ;;  %v2298_v47 = vor.u32 %v2560_v43, %v2295_v46  ;;  %v2366_v53 = vor.u32 %v2579_v49, %v2365_v48  ;;  %v2333_v43 = vld [vmem:[#allocation27 + $0x80] sm:$0xf] }
 0x43f   :  { %1593 = vmatpush.bf16.msrb.mxu2 %v2370_v55 }
 0x440   :  { %v3467_v2 = vsub.f32 %v1253_v33, %v1283_v57  ;;  %v1281_v3 = vrot.slane %v1280_v58, 1  ;;  %v2581_v33 = vld [vmem:[#allocation27 + $0xd4] sm:$0xf0]  ;;  %1581 = vmatpush.bf16.msrb.mxu1 %v2298_v47  ;;  %v2559_v57 = vld [vmem:[#allocation27 + $0x24] sm:$0xf0] }
 0x441   :  { %v2374_v37 = vor.u32 %v2581_v33, %v2373_v32  ;;  %v2286_v62 = vor.u32 %v2559_v57, %v2285_v56  ;;  %v2274_v32 = vor.u32 %v2554_v29, %v2271_v30  ;;  %v2341_v33 = vld [vmem:[#allocation27 + $0x90] sm:$0xf]  ;;  %v2335_v47 = vld [vmem:[#allocation27 + $0x88] sm:$0xf0]  ;;  %v2602_v56 = vld [vmem:[%s3542_s24] sm:$0xff] }
 0x442   :  { %v1287_v11 = vmul.f32 %v3467_v2, %v3467_v2  ;;  %v1282_v8 = vadd.f32 %v1281_v3, %v1280_v58  ;;  %v2558_v58 = vld [vmem:[#allocation27 + $0x24] sm:$0xf]  ;;  %v2577_v3 = vld [vmem:[#allocation27 + $0xb4] sm:$0xf0]  ;;  %v1270_v57 = vld [vmem:[#allocation25] sm:$0x3] }
 0x443   :  { %1566 = vmatpush.bf16.msrb.mxu0 %v2374_v37  ;;  %v2290_v0 = vor.u32 %v2558_v58, %v2287_v63  ;;  %v2358_v7 = vor.u32 %v2577_v3, %v2357_v1  ;;  %v2342_v37 = vor.u32 %v2573_v34, %v2341_v33  ;;  %v1335_v1 = vperm.slane %v1270_v57, 0 }
 0x444   :  { %v1289_v19 = vrot.slane %v1287_v11, 4  ;;  %v1284_v20 = vmul.f32 %v1282_v8, %v3413_v16  ;;  %v2362_v8 = vor.u32 %v2576_v4, %v2359_v9 }
 0x445   :  { %1582 = vmatpush.bf16.msrb.mxu1 %v2290_v0 }
 0x446   :  { %v1290_v27 = vadd.f32 %v1289_v19, %v1287_v11  ;;  %v3472_v28 = vsub.f32 %v1266_v40, %v1284_v20  ;;  %v2561_v40 = vld [vmem:[#allocation27 + $0x34] sm:$0xf0]  ;;  %v2282_v19 = vor.u32 %v2556_v13, %v2279_v14  ;;  %v2575_v20 = vld [vmem:[#allocation27 + $0xa4] sm:$0xf0]  ;;  %1594 = vmatpush.bf16.msrb.mxu2 %v2362_v8 }
 0x447   :  { %v2294_v45 = vor.u32 %v2561_v40, %v2293_v39  ;;  %1567 = vmatpush.bf16.msrb.mxu0 %v2366_v53  ;;  %v2557_v11 = vld [vmem:[#allocation27 + $0x14] sm:$0xf0]  ;;  %v2350_v21 = vor.u32 %v2575_v20, %v2349_v15  ;;  %v1269_v53 = vld [vmem:[#allocation24] sm:$0x3] }
 0x448   :  { %v1291_v35 = vrot.slane %v1290_v27, 2  ;;  %v1288_v36 = vmul.f32 %v3472_v28, %v3472_v28  ;;  %v2278_v12 = vor.u32 %v2557_v11, %v2277_v10  ;;  %v1336_v11 = vperm.slane %v1270_v57, 1  ;;  %v2601_v57 = vld [vmem:[#allocation31 + $0x78] sm:$0xff] }
 0x449   :  { %1555 = vmatpush.bf16.msra.mxu3 %v2294_v45  ;;  %1583 = vmatpush.bf16.msrb.mxu1 %v2282_v19 }
 0x44a   :  { %v1292_v44 = vadd.f32 %v1291_v35, %v1290_v27  ;;  %v1295_v41 = vrot.slane %v1288_v36, 4  ;;  %v2555_v27 = vld [vmem:[#allocation27 + $0x4] sm:$0xf0]  ;;  %v2572_v35 = vld [vmem:[#allocation27 + $0x94] sm:$0xf]  ;;  %1595 = vmatpush.bf16.msrb.mxu2 %v2354_v26 }
 0x44b   :  { %1568 = vmatpush.bf16.msrb.mxu0 %v2358_v7  ;;  %v2270_v31 = vor.u32 %v2555_v27, %v2269_v24  ;;  %v2346_v42 = vor.u32 %v2572_v35, %v2343_v38  ;;  %v1329_v7 = vperm.slane %v1269_v53, 1 }
 0x44c   :  { %v1293_v51 = vrot.slane %v1292_v44, 1  ;;  %v1296_v52 = vadd.f32 %v1295_v41, %v1288_v36  ;;  %v2570_v41 = vld [vmem:[#allocation27 + $0x84] sm:$0xf] }
 0x44d   :  { %1556 = vmatpush.bf16.msra.mxu3 %v2286_v62  ;;  %1584 = vmatpush.bf16.msrb.mxu1 %v2274_v32  ;;  %v2338_v48 = vor.u32 %v2570_v41, %v2335_v47 }
 0x44e   :  { %v1294_v59 = vadd.f32 %v1293_v51, %v1292_v44  ;;  %v1297_v60 = vrot.slane %v1296_v52, 2  ;;  %v2571_v44 = vld [vmem:[#allocation27 + $0x84] sm:$0xf0]  ;;  %1596 = vmatpush.bf16.msrb.mxu2 %v2346_v42  ;;  %v2631_v42 = vld [vmem:[%s3570_s8] ss:$0 sm:$0xff] }
 0x44f   :  { %1569 = vmatpush.bf16.msrb.mxu0 %v2350_v21  ;;  %v2334_v46 = vor.u32 %v2571_v44, %v2333_v43 }
 0x450   :  { %v1301_v5 = vmul.f32 %v1294_v59, %v3413_v16  ;;  %v1298_v6 = vadd.f32 %v1297_v60, %v1296_v52  ;;  %v2603_v52 = vld [vmem:[%s3542_s24 + $0x8] sm:$0xff]  ;;  %v1328_v60 = vperm.slane %v1269_v53, 0 }
 0x451   :  { %1557 = vmatpush.bf16.msra.mxu3 %v2278_v12  ;;  %1878 = vmatpush.bf16.msra.mxu1 %v2603_v52 }
 0x452   :  { %v1303_v17 = vadd.f32 1e-05, %v1301_v5  ;;  %v1299_v18 = vrot.slane %v1298_v6, 1  ;;  %1597 = vmatpush.bf16.msrb.mxu2 %v2338_v48 }
 0x453   :  { %1570 = vmatpush.bf16.msrb.mxu0 %v2342_v37 }
 0x454   :  { %2653 = vrsqrt.f32 %v1303_v17  ;;  %v1300_v25 = vadd.f32 %v1299_v18, %v1298_v6  ;;  %vm1311_vm3 = vweird.f32 %v1303_v17 }
 0x455   :  { %1558 = vmatpush.bf16.msra.mxu3 %v2270_v31  ;;  %1879 = vmatpush.bf16.msra.mxu1 %v2602_v56  ;;  %v2592_v56 = vld [vmem:[#allocation31 + $0x30] sm:$0xff] }
 0x456   :  { %v1302_v36 = vmul.f32 %v1300_v25, %v3413_v16  ;;  %v1385_v25 = vld [vmem:[#allocation28] sm:$0x3] }
 0x457   :  { %1571 = vmatpush.bf16.msrb.mxu0 %v2334_v46  ;;  %v1387_v26 = vperm.slane %v1385_v25, 0  ;;  %v1388_v30 = vperm.slane %v1385_v25, 1 }
 0x458   :  { %v1304_v39 = vadd.f32 1e-05, %v1302_v36 }
 0x45a   :  { %v2654_v40 = vpop.eup %2653  ;;  %2655 = vrsqrt.f32 %v1304_v39  ;;  %vm1321_vm6 = vweird.f32 %v1304_v39 }
 0x45b   :  { %v1306_v45 = vmul.f32 %v2654_v40, %v1303_v17  ;;  %vm1312_vm2 = vweird.f32 %v2654_v40  ;;  %1832 = vmatpush.bf16.msra.mxu0 %v2601_v57 }
 0x45c   :  { %vm1313_vm4 = vmor %vm1311_vm3, %vm1312_vm2 }
 0x45d   :  { %v1307_v49 = vmul.f32 %v2654_v40, %v1306_v45 }
 0x45f   :  { %v1308_v50 = vmul.f32 0.5, %v1307_v49 }
 0x460   :  { %v2656_v51 = vpop.eup %2655 }
 0x461   :  { %v1309_v54 = vsub.f32 1.5, %v1308_v50  ;;  %v1316_v55 = vmul.f32 %v2656_v51, %v1304_v39  ;;  %vm1322_vm5 = vweird.f32 %v2656_v51  ;;  %v2593_v50 = vld [vmem:[#allocation31 + $0x38] sm:$0xff] }
 0x462   :  { %vm1323_vm7 = vmor %vm1321_vm6, %vm1322_vm5  ;;  %1819 = vmatpush.bf16.msrb.mxu3 %v2593_v50 }
 0x463   :  { %v1310_v58 = vmul.f32 %v2654_v40, %v1309_v54  ;;  %v1317_v59 = vmul.f32 %v2656_v51, %v1316_v55 }
 0x465   :  { %v1314_v62 = vsel %vm1313_vm4, %v2654_v40, %v1310_v58  ;;  %v1318_v63 = vmul.f32 0.5, %v1317_v59  ;;  %vm1905_vm4 = vcmask 785408  }
 0x466   :  { %v1325_v0 = vmul.f32 %v1314_v62, %v3467_v2  ;;  %1820 = vmatpush.bf16.msrb.mxu3 %v2592_v56 }
 0x467   :  { %v1319_v3 = vsub.f32 1.5, %v1318_v63 }
 0x468   :  { %v1332_v4 = vmul.f32 %v1328_v60, %v1325_v0  ;;  %v2591_v0 = vld [vmem:[#allocation31 + $0x28] sm:$0xff] }
 0x469   :  { %v1320_v5 = vmul.f32 %v2656_v51, %v1319_v3 }
 0x46a   :  { %v1339_v6 = vadd.f32 %v1335_v1, %v1332_v4  ;;  %v2600_v1 = vld [vmem:[#allocation31 + $0x70] sm:$0xff]  ;;  %1821 = vmatpush.bf16.msrb.mxu3 %v2591_v0 }
 0x46b   :  { %v1324_v9 = vsel %vm1323_vm7, %v2656_v51, %v1320_v5  ;;  %1833 = vmatpush.bf16.msra.mxu0 %v2600_v1 }
 0x46c   :  { %v1326_v10 = vmul.f32 %v1324_v9, %v3472_v28  ;;  %v1343_v8 = vmul.f32 1.442695, %v1339_v6  ;;  %vm1341_vm8 = vcmp.gt.f32.partialorder %v1339_v6, 0.0  ;;  %v1846_v28 = vld [vmem:[#allocation4] sm:$0xff]  ;;  %v2599_v9 = vld [vmem:[#allocation31 + $0x68] sm:$0xff] }
 0x46d   :  { %v1847_v23 = vpack.c.bf16 %v1846_v28, %v1846_v28  ;;  %v2587_v28 = vld [vmem:[#allocation31 + $0x8] sm:$0xff] }
 0x46e   :  { %v1333_v12 = vmul.f32 %v1329_v7, %v1326_v10  ;;  %2657 = vpow2.f32 %v1343_v8  ;;  %v2590_v7 = vld [vmem:[#allocation31 + $0x20] sm:$0xff] }
 0x46f   :  { %1822 = vmatpush.bf16.msrb.mxu3 %v2590_v7  ;;  %1834 = vmatpush.bf16.msra.mxu0 %v2599_v9 }
 0x470   :  { %v1340_v13 = vadd.f32 %v1336_v11, %v1333_v12 }
 0x472   :  { %v1345_v14 = vmul.f32 1.442695, %v1340_v13  ;;  %vm1342_vm9 = vcmp.gt.f32.partialorder %v1340_v13, 0.0 }
 0x474   :  { %v2658_v2 = vpop.eup %2657  ;;  %2659 = vpow2.f32 %v1345_v14  ;;  %v2598_v14 = vld [vmem:[#allocation31 + $0x60] sm:$0xff] }
 0x475   :  { %v2265_v15 = vadd.f32 -1.0, %v2658_v2  ;;  %1835 = vmatpush.bf16.msra.mxu0 %v2598_v14 }
 0x477   :  { %v1349_v17 = vsel %vm1341_vm8, %v1339_v6, %v2265_v15 }
 0x478   :  { %v1351_v18 = vpack.c.bf16 %v1349_v17, %v1349_v17 }
 0x47a   :  { %v2660_v19 = vpop.eup %2659  ;;  %1559 = vmatmul.bf16.vlgmr.msra.gmra.mxu3 %v1351_v18  ;;  %1585 = vmatmul.bf16.vlgmr.msrb.gmra.mxu1 %v1351_v18 }
 0x47b   :  { %v2266_v20 = vadd.f32 -1.0, %v2660_v19  ;;  %v2588_v19 = vld [vmem:[#allocation31 + $0x10] sm:$0xff] }
 0x47d   :  { %v1350_v21 = vsel %vm1342_vm9, %v1340_v13, %v2266_v20  ;;  %v2589_v13 = vld [vmem:[#allocation31 + $0x18] sm:$0xff] }
 0x47e   :  { %v1352_v22 = vpack.c.bf16 %v1350_v21, %v1350_v21  ;;  %1823 = vmatpush.bf16.msrb.mxu3 %v2589_v13  ;;  %v2597_v20 = vld [vmem:[#allocation31 + $0x58] sm:$0xff] }
 0x47f   :  { %1836 = vmatpush.bf16.msra.mxu0 %v2597_v20 }
 0x480   :  { %1572 = vmatmul.bf16.vlgmr.msrb.gmra.mxu0 %v1352_v22  ;;  %1598 = vmatmul.bf16.vlgmr.msrb.gmra.mxu2 %v1352_v22 }
 0x482   :  { %1824 = vmatpush.bf16.msrb.mxu3 %v2588_v19 }
 0x486   :  { %1825 = vmatpush.bf16.msrb.mxu3 %v2587_v28 }
 0x48a   :  { %2469 = vmatmul.msk.bf16.vlgmr.msra.gmra.mxu1 %vm1868_vm10, %v1847_v23  ;;  %v2596_v23 = vld [vmem:[#allocation31 + $0x50] sm:$0xff] }
 0x48b   :  { %1837 = vmatpush.bf16.msra.mxu0 %v2596_v23 }
 0x4f7   :  { %v1586_v24 = vpop.f32.mrf.mxu1 }
 0x4f8   :  { %v1587_v34 = vadd.f32 %v1586_v24, %v1388_v30 }
 0x4fd   :  { %v1560_v27 = vpop.f32.mrf.mxu3  ;;  %v1573_v29 = vpop.f32.mrf.mxu0 }
 0x4fe   :  { %v1561_v31 = vadd.f32 %v1560_v27, %v1387_v26  ;;  %v2586_v27 = vld [vmem:[#allocation31] sm:$0xff] }
 0x4ff   :  { %v1588_v32 = vpop.f32.mrf.mxu1  ;;  %1826 = vmatpush.bf16.msrb.mxu3 %v2586_v27 }
 0x500   :  { %v1574_v33 = vadd.f32 %v1573_v29, %v1561_v31  ;;  %v2595_v29 = vld [vmem:[#allocation31 + $0x48] sm:$0xff]  ;;  %v2594_v32 = vld [vmem:[#allocation31 + $0x40] sm:$0xff] }
 0x501   :  { %1838 = vmatpush.bf16.msra.mxu0 %v2595_v29 }
 0x502   :  { %v1605_v35 = vrot.slane %v1574_v33, 4 }
 0x503   :  { %v1599_v36 = vpop.f32.mrf.mxu2 }
 0x504   :  { %v1606_v37 = vadd.f32 %v1605_v35, %v1574_v33  ;;  %v1600_v38 = vadd.f32 %v1599_v36, %v1587_v34 }
 0x505   :  { %v1562_v39 = vpop.f32.mrf.mxu3  ;;  %v1575_v40 = vpop.f32.mrf.mxu0  ;;  %1839 = vmatpush.bf16.msra.mxu0 %v2594_v32 }
 0x506   :  { %v1607_v43 = vrot.slane %v1606_v37, 2  ;;  %v1611_v44 = vrot.slane %v1600_v38, 4  ;;  %v1604_v39 = vld [vmem:[#allocation30] sm:$0x3] }
 0x507   :  { %v1881_v41 = vpop.f32.mrf.mxu1 }
 0x508   :  { %v1608_v45 = vadd.f32 %v1607_v43, %v1606_v37  ;;  %v1612_v46 = vadd.f32 %v1611_v44, %v1600_v38  ;;  %v1882_v47 = vadd.f32 %v2631_v42, %v1881_v41 }
 0x50a   :  { %v1609_v48 = vrot.slane %v1608_v45, 1  ;;  %v1613_v49 = vrot.slane %v1612_v46, 2  ;;  %1897 = vrot.lane.b32.xlu1 %v1882_v47, %s3188_s15  ;;  %v1669_v47 = vperm.slane %v1604_v39, 0 }
 0x50b   :  { %v1601_v51 = vpop.f32.mrf.mxu2 }
 0x50c   :  { %v1610_v52 = vadd.f32 %v1609_v48, %v1608_v45  ;;  %v1614_v53 = vadd.f32 %v1613_v49, %v1612_v46 }
 0x50e   :  { %v1617_v54 = vmul.f32 %v1610_v52, %v3413_v16  ;;  %v1615_v55 = vrot.slane %v1614_v53, 1 }
 0x50f   :  { %v1883_v58 = vpop.f32.mrf.mxu1 }
 0x510   :  { %v3491_v59 = vsub.f32 %v1574_v33, %v1617_v54  ;;  %v1616_v60 = vadd.f32 %v1615_v55, %v1614_v53  ;;  %v1670_v54 = vperm.slane %v1604_v39, 1 }
 0x512   :  { %v1621_v62 = vmul.f32 %v3491_v59, %v3491_v59  ;;  %v1618_v63 = vmul.f32 %v1616_v60, %v3413_v16 }
 0x514   :  { %v1623_v3 = vrot.slane %v1621_v62, 4  ;;  %v3496_v4 = vsub.f32 %v1600_v38, %v1618_v63 }
 0x516   :  { %v1624_v5 = vadd.f32 %v1623_v3, %v1621_v62  ;;  %v1622_v6 = vmul.f32 %v3496_v4, %v3496_v4 }
 0x518   :  { %v1625_v10 = vrot.slane %v1624_v5, 2  ;;  %v1629_v11 = vrot.slane %v1622_v6, 4 }
 0x51a   :  { %v1626_v8 = vadd.f32 %v1625_v10, %v1624_v5  ;;  %v1630_v12 = vadd.f32 %v1629_v11, %v1622_v6  ;;  %v1902_v6 = vpop.permute.xlu2 %1901  ;;  %v2632_v10 = vld [vmem:[%s3572_s2] ss:$0 sm:$0xff] }
 0x51c   :  { %v1627_v2 = vrot.slane %v1626_v8, 1  ;;  %v1631_v15 = vrot.slane %v1630_v12, 2 }
 0x51e   :  { %v1628_v17 = vadd.f32 %v1627_v2, %v1626_v8  ;;  %v1632_v18 = vadd.f32 %v1631_v15, %v1630_v12 }
 0x520   :  { %v1635_v21 = vmul.f32 %v1628_v17, %v3413_v16  ;;  %v1633_v22 = vrot.slane %v1632_v18, 1 }
 0x522   :  { %v1637_v24 = vadd.f32 1e-05, %v1635_v21  ;;  %v1634_v25 = vadd.f32 %v1633_v22, %v1632_v18 }
 0x524   :  { %2661 = vrsqrt.f32 %v1637_v24  ;;  %v1636_v26 = vmul.f32 %v1634_v25, %v3413_v16  ;;  %v1603_v16 = vld [vmem:[%s3571_s28] sm:$0x3]  ;;  %vm1645_vm12 = vweird.f32 %v1637_v24 }
 0x525   :  { %v1662_v44 = vperm.slane %v1603_v16, 0  ;;  %v1663_v50 = vperm.slane %v1603_v16, 1 }
 0x526   :  { %v1638_v30 = vadd.f32 1e-05, %v1636_v26 }
 0x528   :  { %2663 = vrsqrt.f32 %v1638_v30  ;;  %vm1655_vm15 = vweird.f32 %v1638_v30 }
 0x52a   :  { %v2662_v31 = vpop.eup %2661 }
 0x52b   :  { %v1640_v33 = vmul.f32 %v2662_v31, %v1637_v24  ;;  %vm1646_vm11 = vweird.f32 %v2662_v31 }
 0x52c   :  { %vm1647_vm13 = vmor %vm1645_vm12, %vm1646_vm11 }
 0x52d   :  { %v1641_v34 = vmul.f32 %v2662_v31, %v1640_v33 }
 0x52e   :  { %v2664_v35 = vpop.eup %2663 }
 0x52f   :  { %v1642_v36 = vmul.f32 0.5, %v1641_v34  ;;  %v1650_v37 = vmul.f32 %v2664_v35, %v1638_v30  ;;  %vm1656_vm14 = vweird.f32 %v2664_v35 }
 0x530   :  { %vm1657_vm0 = vmor %vm1655_vm15, %vm1656_vm14 }
 0x531   :  { %v1643_v38 = vsub.f32 1.5, %v1642_v36  ;;  %v1651_v42 = vmul.f32 %v2664_v35, %v1650_v37 }
 0x533   :  { %v1644_v40 = vmul.f32 %v2662_v31, %v1643_v38  ;;  %v1652_v43 = vmul.f32 0.5, %v1651_v42 }
 0x535   :  { %v1648_v41 = vsel %vm1647_vm13, %v2662_v31, %v1644_v40  ;;  %v1653_v45 = vsub.f32 1.5, %v1652_v43 }
 0x536   :  { %v1659_v46 = vmul.f32 %v1648_v41, %v3491_v59 }
 0x537   :  { %v1654_v48 = vmul.f32 %v2664_v35, %v1653_v45 }
 0x538   :  { %v1666_v49 = vmul.f32 %v1662_v44, %v1659_v46 }
 0x539   :  { %v1658_v51 = vsel %vm1657_vm0, %v2664_v35, %v1654_v48 }
 0x53a   :  { %v1673_v52 = vadd.f32 %v1669_v47, %v1666_v49  ;;  %v1660_v53 = vmul.f32 %v1658_v51, %v3496_v4 }
 0x53c   :  { %v1667_v55 = vmul.f32 %v1663_v50, %v1660_v53  ;;  %v1677_v56 = vmul.f32 1.442695, %v1673_v52  ;;  %vm1675_vm2 = vcmp.gt.f32.partialorder %v1673_v52, 0.0 }
 0x53e   :  { %v1674_v57 = vadd.f32 %v1670_v54, %v1667_v55  ;;  %2665 = vpow2.f32 %v1677_v56 }
 0x540   :  { %v1679_v58 = vmul.f32 1.442695, %v1674_v57  ;;  %vm1676_vm3 = vcmp.gt.f32.partialorder %v1674_v57, 0.0 }
 0x542   :  { %2667 = vpow2.f32 %v1679_v58 }
 0x544   :  { %v2666_v60 = vpop.eup %2665 }
 0x545   :  { %v2395_v62 = vadd.f32 -1.0, %v2666_v60 }
 0x547   :  { %v1683_v59 = vsel %vm1675_vm2, %v1673_v52, %v2395_v62 }
 0x548   :  { %v2668_v63 = vpop.eup %2667  ;;  %v1685_v0 = vpack.c.bf16 %v1683_v59, %v1683_v59 }
 0x549   :  { %v2396_v1 = vadd.f32 -1.0, %v2668_v63 }
 0x54a   :  { %1827 = vmatmul.bf16.vlgmr.msrb.gmra.mxu3 %v1685_v0 }
 0x54b   :  { %v1684_v3 = vsel %vm1676_vm3, %v1674_v57, %v2396_v1 }
 0x54c   :  { %v1686_v5 = vpack.c.bf16 %v1684_v3, %v1684_v3 }
 0x54e   :  { %1840 = vmatmul.bf16.vlgmr.msra.gmra.mxu0 %v1686_v5 }
 0x57c   :  { %v1898_v4 = vpop.permute.xlu1 %1897 }
 0x57d   :  { %v1904_v7 = vsel %vm1123_vm1, %v3457_v61, %v1898_v4 }
 0x57e   :  { %v1906_v9 = vsel %vm1905_vm4, %v1904_v7, %v1902_v6 }
 0x57f   :  { %1907 = vst [vmem:[%s3544_s26 + $0x8] sm:$0xff] %v1906_v9 }
 0x5cb   :  { %v1841_v11 = vpop.f32.mrf.mxu0 }
 0x5cd   :  { %v1828_v8 = vpop.f32.mrf.mxu3 }
 0x5ce   :  { %v1829_v12 = vadd.f32 %v2632_v10, %v1828_v8 }
 0x5d0   :  { %v1842_v13 = vadd.f32 %v1841_v11, %v1829_v12 }
 0x5d2   :  { %v1845_v14 = vmax.f32 %v1842_v13, 0.0 }
 0x5d3   :  { %v1843_v2 = vpop.f32.mrf.mxu0 }
 0x5d4   :  { %1908 = vst [vmem:[%s3544_s26 + $0x10] sm:$0xff] %v1845_v14 }
 0x5d5   :  { %v1830_v61 = vpop.f32.mrf.mxu3 }
 0x5d6   :  { %1913 = vsyncpa [#allocation3], 1 }
 0x5d7   :  { %1914 = vsyncpa [#allocation5], 1 }
 0x5d8   :  { %1915 = vsyncpa [#allocation8], 1 }
 0x5d9   :  { %1916 = vsyncpa [#allocation11], 1 }
 0x5da   :  { %1917 = vsyncpa [#allocation14], 1 }
 0x5db   :  { %1918 = vsyncpa [#allocation17], 1 }
 0x5dc   :  { %1919 = vsyncpa [#allocation20], 1 }
 0x5dd   :  { %1920 = vsyncpa [#allocation23], 1 }
 0x5de   :  { %1921 = vsyncpa [#allocation26], 1 }
 0x5df   :  { %1922 = vsyncpa [#allocation29], 1 }
 0x5e0   :  { %1923 = vsyncpa [#allocation32], 1 }

</bundles_post_ra>
